<compile_context>
chip_gen: v7x
topology: tpu7x:2x2x1
jax: 0.10.0
libtpu: 0.0.40
codegen_flags: <defaults>
</compile_context>

<pallas_src>
import functools

import jax
import jax.numpy as jnp
from jax.experimental import pallas as pl
from jax.experimental.pallas import tpu as pltpu

DIM = 8          # scaled-down version of the original DIM = 64
EDGE = 20        # kept for parity with the reference (unused: edgepredictor=False)


# ----------------------------------------------------------------------------
# Pallas kernels
# ----------------------------------------------------------------------------
def _encoder_kernel(x_ref, a_self_ref, a_norm_ref, noise_ref,
                    g1w1_ref, g1b1_ref, g1w2_ref, g1b2_ref,
                    g2w1_ref, g2b1_ref, g2w2_ref, g2b2_ref,
                    mu_w_ref, mu_b_ref, ls_w_ref, ls_b_ref,
                    z_ref, adj_ref, tmp_ref, *, B, N):
    """Whole VGAE encoder fused into one kernel.

    x         : (B*N, N)   node features (flat graph-batched)
    a_self    : (B, N, N)  per-graph A + I   (GIN-style aggregation)
    a_norm    : (B, N, N)  per-graph D^-1/2 (A+I) D^-1/2  (GCNConv normalization)
    noise     : (B*N, N)   eps for reparameterization
    outputs   : z (B*N, N), adj_logits (B, N, N)
    tmp_ref   : (B*N, N)   VMEM scratch holding the propagated activations.
    """

    def propagate(a_ref, xw):
        # Block-diagonal A @ (XW): B small (N,N)@(N,N) matmuls, written into the
        # shared VMEM scratch and read back as one (B*N, N) slab.
        for b in range(B):
            tmp_ref[pl.ds(b * N, N), :] = jnp.dot(
                a_ref[b], xw[b * N:(b + 1) * N, :],
                preferred_element_type=jnp.float32)
        return tmp_ref[...]

    x = x_ref[...]

    # ---- GIN-style layer 1: relu(A (X W1) + b1) -> relu(. W2 + b2) ----
    h = jnp.dot(x, g1w1_ref[...], preferred_element_type=jnp.float32)
    h = jnp.maximum(propagate(a_self_ref, h) + g1b1_ref[...], 0.0)
    h = jnp.maximum(
        jnp.dot(h, g1w2_ref[...], preferred_element_type=jnp.float32)
        + g1b2_ref[...], 0.0)

    # ---- GIN-style layer 2 ----
    h = jnp.dot(h, g2w1_ref[...], preferred_element_type=jnp.float32)
    h = jnp.maximum(propagate(a_self_ref, h) + g2b1_ref[...], 0.0)
    h = jnp.dot(h, g2w2_ref[...], preferred_element_type=jnp.float32) + g2b2_ref[...]

    # ---- conv_mu / conv_logstd (GCN-normalized adjacency), relu ----
    m = jnp.maximum(
        propagate(a_norm_ref,
                  jnp.dot(h, mu_w_ref[...], preferred_element_type=jnp.float32))
        + mu_b_ref[...], 0.0)
    s = jnp.maximum(
        propagate(a_norm_ref,
                  jnp.dot(h, ls_w_ref[...], preferred_element_type=jnp.float32))
        + ls_b_ref[...], 0.0)

    # ---- reparameterization: z = mu + eps * exp(logstd) ----
    z = m + noise_ref[...] * jnp.exp(s)
    z_ref[...] = z

    # ---- per-graph adj_logits[b] = Z_b @ Z_b^T ----
    for b in range(B):
        zb = z[b * N:(b + 1) * N, :]
        adj_ref[b] = jnp.dot(zb, zb.T, preferred_element_type=jnp.float32)


def _classifier_kernel(x_ref, mask_ref,
                       w1_ref, b1_ref, s1_ref, t1_ref,
                       w2_ref, b2_ref, s2_ref, t2_ref,
                       w3_ref, b3_ref, o_ref):
    """Fused classifier: (x * mask) -> fc1+relu+bn1 -> fc2+relu+bn2 -> fc3+log_softmax.

    Dropout is identity (eval mode); BatchNorm is folded into scale (s) / shift (t).
    """
    xm = x_ref[...] * mask_ref[...]
    h = jnp.maximum(
        jnp.dot(xm, w1_ref[...], preferred_element_type=jnp.float32) + b1_ref[...], 0.0)
    h = h * s1_ref[...] + t1_ref[...]
    h = jnp.maximum(
        jnp.dot(h, w2_ref[...], preferred_element_type=jnp.float32) + b2_ref[...], 0.0)
    h = h * s2_ref[...] + t2_ref[...]
    y = jnp.dot(h, w3_ref[...], preferred_element_type=jnp.float32) + b3_ref[...]
    mx = jnp.max(y, axis=-1, keepdims=True)
    lse = mx + jnp.log(jnp.sum(jnp.exp(y - mx), axis=-1, keepdims=True))
    o_ref[...] = y - lse


# ----------------------------------------------------------------------------
# Pallas wrappers (tiny working set -> single whole-array block, no grid)
# ----------------------------------------------------------------------------
def fused_encoder(x, a_self, a_norm, noise, p):
    BN, N = x.shape
    B = a_self.shape[0]
    kernel = functools.partial(_encoder_kernel, B=B, N=N)
    z, adj_logits = pl.pallas_call(
        kernel,
        out_shape=(jax.ShapeDtypeStruct((BN, N), jnp.float32),
                   jax.ShapeDtypeStruct((B, N, N), jnp.float32)),
        scratch_shapes=[pltpu.VMEM((BN, N), jnp.float32)],
    )(x, a_self, a_norm, noise,
      p["gin1_w1"], p["gin1_b1"], p["gin1_w2"], p["gin1_b2"],
      p["gin2_w1"], p["gin2_b1"], p["gin2_w2"], p["gin2_b2"],
      p["mu_w"], p["mu_b"], p["ls_w"], p["ls_b"])
    return z, adj_logits


def fused_classifier(x_flat, mask_flat, p):
    B = x_flat.shape[0]
    C = p["fc3_w"].shape[1]
    return pl.pallas_call(
        _classifier_kernel,
        out_shape=jax.ShapeDtypeStruct((B, C), jnp.float32),
    )(x_flat, mask_flat,
      p["fc1_w"], p["fc1_b"], p["bn1_scale"], p["bn1_shift"],
      p["fc2_w"], p["fc2_b"], p["bn2_scale"], p["bn2_shift"],
      p["fc3_w"], p["fc3_b"])


# ----------------------------------------------------------------------------
# Plain-JAX glue (all hoisted out of the hot forward path where possible)
# ----------------------------------------------------------------------------
def make_adjacency(B, N):
    """Deterministic per-graph ring+skip adjacency; returns (B, N, N)."""
    idx = jnp.arange(N)
    adj = jnp.zeros((N, N), jnp.float32)
    adj = adj.at[idx, (idx + 1) % N].set(1.0)
    adj = adj.at[(idx + 1) % N, idx].set(1.0)
    adj = adj.at[idx, (idx + 3) % N].set(1.0)
    adj = adj.at[(idx + 3) % N, idx].set(1.0)
    return jnp.tile(adj[None], (B, 1, 1))


def precompute_adjacency_ops(adj_per_graph):
    """Precompute (once, outside forward) the two per-graph propagation operators."""
    _, N, _ = adj_per_graph.shape
    eye = jnp.eye(N, dtype=jnp.float32)[None]
    a_hat = adj_per_graph + eye
    a_self = a_hat                                   # GIN-style A + I
    d_inv_sqrt = 1.0 / jnp.sqrt(jnp.sum(a_hat, axis=-1))
    a_norm = a_hat * d_inv_sqrt[:, :, None] * d_inv_sqrt[:, None, :]  # GCNConv norm
    return a_self, a_norm


def init_params(key, N, out_channels):
    ks = iter(jax.random.split(key, 16))
    dense = lambda kk, shape: 0.1 * jax.random.normal(kk, shape, jnp.float32)
    p = {}
    # Encoder GNN base: 2 GIN-style layers keeping feature dim N.
    p["gin1_w1"], p["gin1_b1"] = dense(next(ks), (N, N)), jnp.zeros((1, N), jnp.float32)
    p["gin1_w2"], p["gin1_b2"] = dense(next(ks), (N, N)), jnp.zeros((1, N), jnp.float32)
    p["gin2_w1"], p["gin2_b1"] = dense(next(ks), (N, N)), jnp.zeros((1, N), jnp.float32)
    p["gin2_w2"], p["gin2_b2"] = dense(next(ks), (N, N)), jnp.zeros((1, N), jnp.float32)
    # conv_mu / conv_logstd (GCNConv N->N)
    p["mu_w"], p["mu_b"] = dense(next(ks), (N, N)), jnp.zeros((1, N), jnp.float32)
    p["ls_w"], p["ls_b"] = dense(next(ks), (N, N)), jnp.zeros((1, N), jnp.float32)
    # Classifier MLP.  NOTE: the original __init__ declares fc1 = Linear(2*dim, 4*dim)
    # but forward feeds a (B, N*N) tensor; we size fc1 to N*N so forward runs.
    dim = 2 * DIM                       # aggr == 'cat'
    h1, h2 = 4 * dim, 8 * dim
    p["fc1_w"], p["fc1_b"] = dense(next(ks), (N * N, h1)), jnp.zeros((1, h1), jnp.float32)
    p["fc2_w"], p["fc2_b"] = dense(next(ks), (h1, h2)), jnp.zeros((1, h2), jnp.float32)
    p["fc3_w"], p["fc3_b"] = (dense(next(ks), (h2, out_channels)),
                              jnp.zeros((1, out_channels), jnp.float32))
    # BatchNorm (eval mode) folded once into scale/shift.
    eps_bn = 1e-5
    for name, d in (("bn1", h1), ("bn2", h2)):
        gamma = 1.0 + 0.1 * jax.random.normal(next(ks), (1, d), jnp.float32)
        beta = 0.1 * jax.random.normal(next(ks), (1, d), jnp.float32)
        mean = jnp.zeros((1, d), jnp.float32)
        var = jnp.ones((1, d), jnp.float32)
        scale = gamma / jnp.sqrt(var + eps_bn)
        p[f"{name}_scale"] = scale
        p[f"{name}_shift"] = beta - mean * scale
    return p


# ----------------------------------------------------------------------------
# NeuroSparse forward
# ----------------------------------------------------------------------------
@jax.jit
def neurosparse_forward(params, x, a_self, a_norm, adj_per_graph, noise):
    BN, N = x.shape
    B = adj_per_graph.shape[0]

    # ---------------- VGAE encoder (single fused Pallas kernel) ----------------
    # TODO(synk): original conv_base is a chemistry-library GNN('gin') with atom/edge
    # embeddings and dropout; replaced by 2 dense GIN-style layers, edge_attr ignored.
    z, adj_logits = fused_encoder(x, a_self, a_norm, noise, params)

    # ---------------- to_dense_ ----------------
    edge_dense_org = (adj_per_graph > 0).astype(jnp.float32)

    # ---------------- GraphClassifier ----------------
    # TODO(synk): per-graph torch.topk threshold selection kept in XLA glue
    # (lax.top_k); an in-kernel 256-element partial sort does not lower cleanly.
    abs_flat = jnp.abs(adj_logits).reshape(B, N * N)
    num_elements = int(0.3 * N * N)
    thresh = jax.lax.top_k(abs_flat, num_elements)[0][:, -1]
    mask_flat = ((abs_flat >= thresh[:, None]) & (abs_flat != 0.0)).astype(jnp.float32)

    # x.view(B,N,N) * mask, then .view(B,-1) == row-major flat multiply.
    x_flat = x.reshape(B, N * N)
    xy = fused_classifier(x_flat, mask_flat, params)

    # edgepredictor=False, site_adapt=False -> (xy, edge_dense_org, adj_logits, z)
    return xy, edge_dense_org, adj_logits, z


# ----------------------------------------------------------------------------
if __name__ == "__main__":
    B, N = 4, 16               # 4 graphs, 16 nodes each (feature dim == N)
    out_channels = 2

    key = jax.random.PRNGKey(0)
    kp, kx, kn = jax.random.split(key, 3)

    params = init_params(kp, N, out_channels)
    x = jax.random.normal(kx, (B * N, N), jnp.float32)       # data.x
    noise = jax.random.normal(kn, (B * N, N), jnp.float32)   # torch.randn_like(s)
    adj_per_graph = make_adjacency(B, N)
    a_self, a_norm = precompute_adjacency_ops(adj_per_graph)  # hoisted out of forward

    out = neurosparse_forward(params, x, a_self, a_norm, adj_per_graph, noise)
    out = jax.block_until_ready(out)

    xy, edge_dense_org, adj_logits, z = out
    assert xy.shape == (B, out_channels)
    assert edge_dense_org.shape == (B, N, N)
    assert adj_logits.shape == (B, N, N)
    assert z.shape == (B * N, N)
    print("KERNEL_OK")
</pallas_src>

<mosaic_0001>
module attributes {stable_mosaic.version = 11 : i64} {
  func.func @_encoder_kernel(%arg0: memref<64x16xf32, #tpu.memory_space<vmem>>, %arg1: memref<4x16x16xf32, #tpu.memory_space<vmem>>, %arg2: memref<4x16x16xf32, #tpu.memory_space<vmem>>, %arg3: memref<64x16xf32, #tpu.memory_space<vmem>>, %arg4: memref<16x16xf32, #tpu.memory_space<vmem>>, %arg5: memref<1x16xf32, #tpu.memory_space<vmem>>, %arg6: memref<16x16xf32, #tpu.memory_space<vmem>>, %arg7: memref<1x16xf32, #tpu.memory_space<vmem>>, %arg8: memref<16x16xf32, #tpu.memory_space<vmem>>, %arg9: memref<1x16xf32, #tpu.memory_space<vmem>>, %arg10: memref<16x16xf32, #tpu.memory_space<vmem>>, %arg11: memref<1x16xf32, #tpu.memory_space<vmem>>, %arg12: memref<16x16xf32, #tpu.memory_space<vmem>>, %arg13: memref<1x16xf32, #tpu.memory_space<vmem>>, %arg14: memref<16x16xf32, #tpu.memory_space<vmem>>, %arg15: memref<1x16xf32, #tpu.memory_space<vmem>>, %arg16: memref<64x16xf32, #tpu.memory_space<vmem>>, %arg17: memref<4x16x16xf32, #tpu.memory_space<vmem>>, %arg18: memref<64x16xf32, #tpu.memory_space<vmem>>) attributes {dimension_semantics = [], scalar_prefetch = 0 : i64, scratch_operands = 1 : i64, tpu.core_type = #tpu.core_type<tc>} {
    %c0 = arith.constant 0 : index
    %c0_0 = arith.constant 0 : index
    %0 = vector.load %arg0[%c0, %c0_0] : memref<64x16xf32, #tpu.memory_space<vmem>>, vector<64x16xf32>
    %c0_1 = arith.constant 0 : index
    %c0_2 = arith.constant 0 : index
    %1 = vector.load %arg4[%c0_1, %c0_2] : memref<16x16xf32, #tpu.memory_space<vmem>>, vector<16x16xf32>
    %cst = arith.constant dense<0.000000e+00> : vector<64x16xf32>
    %2 = tpu.matmul %0, %1, %cst {dimension_numbers = #tpu.dot_dimension_numbers<[1], [0], [0], [1], [0, 0, 1, 1], [], []>} : vector<64x16xf32>, vector<16x16xf32>, vector<64x16xf32> -> vector<64x16xf32>
    %c0_3 = arith.constant 0 : index
    %c0_4 = arith.constant 0 : index
    %c0_5 = arith.constant 0 : index
    %3 = vector.load %arg1[%c0_3, %c0_4, %c0_5] : memref<4x16x16xf32, #tpu.memory_space<vmem>>, vector<1x16x16xf32>
    %4 = vector.shape_cast %3 : vector<1x16x16xf32> to vector<16x16xf32>
    %5 = vector.extract_strided_slice %2 {offsets = [0, 0], sizes = [16, 16], strides = [1, 1]} : vector<64x16xf32> to vector<16x16xf32>
    %cst_6 = arith.constant dense<0.000000e+00> : vector<16x16xf32>
    %6 = tpu.matmul %4, %5, %cst_6 {dimension_numbers = #tpu.dot_dimension_numbers<[1], [0], [0], [1], [0, 0, 1, 1], [], []>} : vector<16x16xf32>, vector<16x16xf32>, vector<16x16xf32> -> vector<16x16xf32>
    %c0_7 = arith.constant 0 : index
    %c0_8 = arith.constant 0 : index
    %7 = vector.load %arg18[%c0_7, %c0_8] : memref<64x16xf32, #tpu.memory_space<vmem>>, vector<16x16xf32>
    tpu.vector_store %arg18[%c0_7, %c0_8], %6 {strides = array<i32>} : memref<64x16xf32, #tpu.memory_space<vmem>>, vector<16x16xf32>,
    %c1 = arith.constant 1 : index
    %c0_9 = arith.constant 0 : index
    %c0_10 = arith.constant 0 : index
    %8 = vector.load %arg1[%c1, %c0_9, %c0_10] : memref<4x16x16xf32, #tpu.memory_space<vmem>>, vector<1x16x16xf32>
    %9 = vector.shape_cast %8 : vector<1x16x16xf32> to vector<16x16xf32>
    %10 = vector.extract_strided_slice %2 {offsets = [16, 0], sizes = [16, 16], strides = [1, 1]} : vector<64x16xf32> to vector<16x16xf32>
    %cst_11 = arith.constant dense<0.000000e+00> : vector<16x16xf32>
    %11 = tpu.matmul %9, %10, %cst_11 {dimension_numbers = #tpu.dot_dimension_numbers<[1], [0], [0], [1], [0, 0, 1, 1], [], []>} : vector<16x16xf32>, vector<16x16xf32>, vector<16x16xf32> -> vector<16x16xf32>
    %c16 = arith.constant 16 : index
    %c0_12 = arith.constant 0 : index
    %12 = vector.load %arg18[%c16, %c0_12] : memref<64x16xf32, #tpu.memory_space<vmem>>, vector<16x16xf32>
    tpu.vector_store %arg18[%c16, %c0_12], %11 {strides = array<i32>} : memref<64x16xf32, #tpu.memory_space<vmem>>, vector<16x16xf32>,
    %c2 = arith.constant 2 : index
    %c0_13 = arith.constant 0 : index
    %c0_14 = arith.constant 0 : index
    %13 = vector.load %arg1[%c2, %c0_13, %c0_14] : memref<4x16x16xf32, #tpu.memory_space<vmem>>, vector<1x16x16xf32>
    %14 = vector.shape_cast %13 : vector<1x16x16xf32> to vector<16x16xf32>
    %15 = vector.extract_strided_slice %2 {offsets = [32, 0], sizes = [16, 16], strides = [1, 1]} : vector<64x16xf32> to vector<16x16xf32>
    %cst_15 = arith.constant dense<0.000000e+00> : vector<16x16xf32>
    %16 = tpu.matmul %14, %15, %cst_15 {dimension_numbers = #tpu.dot_dimension_numbers<[1], [0], [0], [1], [0, 0, 1, 1], [], []>} : vector<16x16xf32>, vector<16x16xf32>, vector<16x16xf32> -> vector<16x16xf32>
    %c32 = arith.constant 32 : index
    %c0_16 = arith.constant 0 : index
    %17 = vector.load %arg18[%c32, %c0_16] : memref<64x16xf32, #tpu.memory_space<vmem>>, vector<16x16xf32>
    tpu.vector_store %arg18[%c32, %c0_16], %16 {strides = array<i32>} : memref<64x16xf32, #tpu.memory_space<vmem>>, vector<16x16xf32>,
    %c3 = arith.constant 3 : index
    %c0_17 = arith.constant 0 : index
    %c0_18 = arith.constant 0 : index
    %18 = vector.load %arg1[%c3, %c0_17, %c0_18] : memref<4x16x16xf32, #tpu.memory_space<vmem>>, vector<1x16x16xf32>
    %19 = vector.shape_cast %18 : vector<1x16x16xf32> to vector<16x16xf32>
    %20 = vector.extract_strided_slice %2 {offsets = [48, 0], sizes = [16, 16], strides = [1, 1]} : vector<64x16xf32> to vector<16x16xf32>
    %cst_19 = arith.constant dense<0.000000e+00> : vector<16x16xf32>
    %21 = tpu.matmul %19, %20, %cst_19 {dimension_numbers = #tpu.dot_dimension_numbers<[1], [0], [0], [1], [0, 0, 1, 1], [], []>} : vector<16x16xf32>, vector<16x16xf32>, vector<16x16xf32> -> vector<16x16xf32>
    %c48 = arith.constant 48 : index
    %c0_20 = arith.constant 0 : index
    %22 = vector.load %arg18[%c48, %c0_20] : memref<64x16xf32, #tpu.memory_space<vmem>>, vector<16x16xf32>
    tpu.vector_store %arg18[%c48, %c0_20], %21 {strides = array<i32>} : memref<64x16xf32, #tpu.memory_space<vmem>>, vector<16x16xf32>,
    %c0_21 = arith.constant 0 : index
    %c0_22 = arith.constant 0 : index
    %23 = vector.load %arg18[%c0_21, %c0_22] : memref<64x16xf32, #tpu.memory_space<vmem>>, vector<64x16xf32>
    %c0_23 = arith.constant 0 : index
    %c0_24 = arith.constant 0 : index
    %24 = vector.load %arg5[%c0_23, %c0_24] : memref<1x16xf32, #tpu.memory_space<vmem>>, vector<1x16xf32>
    %25 = vector.broadcast %24 : vector<1x16xf32> to vector<64x16xf32>
    %26 = arith.addf %23, %25 : vector<64x16xf32>
    %cst_25 = arith.constant 0.000000e+00 : f32
    %27 = vector.broadcast %cst_25 : f32 to vector<64x16xf32>
    %28 = arith.maximumf %26, %27 : vector<64x16xf32>
    %c0_26 = arith.constant 0 : index
    %c0_27 = arith.constant 0 : index
    %29 = vector.load %arg6[%c0_26, %c0_27] : memref<16x16xf32, #tpu.memory_space<vmem>>, vector<16x16xf32>
    %cst_28 = arith.constant dense<0.000000e+00> : vector<64x16xf32>
    %30 = tpu.matmul %28, %29, %cst_28 {dimension_numbers = #tpu.dot_dimension_numbers<[1], [0], [0], [1], [0, 0, 1, 1], [], []>} : vector<64x16xf32>, vector<16x16xf32>, vector<64x16xf32> -> vector<64x16xf32>
    %c0_29 = arith.constant 0 : index
    %c0_30 = arith.constant 0 : index
    %31 = vector.load %arg7[%c0_29, %c0_30] : memref<1x16xf32, #tpu.memory_space<vmem>>, vector<1x16xf32>
    %32 = vector.broadcast %31 : vector<1x16xf32> to vector<64x16xf32>
    %33 = arith.addf %30, %32 : vector<64x16xf32>
    %cst_31 = arith.constant 0.000000e+00 : f32
    %34 = vector.broadcast %cst_31 : f32 to vector<64x16xf32>
    %35 = arith.maximumf %33, %34 : vector<64x16xf32>
    %c0_32 = arith.constant 0 : index
    %c0_33 = arith.constant 0 : index
    %36 = vector.load %arg8[%c0_32, %c0_33] : memref<16x16xf32, #tpu.memory_space<vmem>>, vector<16x16xf32>
    %cst_34 = arith.constant dense<0.000000e+00> : vector<64x16xf32>
    %37 = tpu.matmul %35, %36, %cst_34 {dimension_numbers = #tpu.dot_dimension_numbers<[1], [0], [0], [1], [0, 0, 1, 1], [], []>} : vector<64x16xf32>, vector<16x16xf32>, vector<64x16xf32> -> vector<64x16xf32>
    %c0_35 = arith.constant 0 : index
    %c0_36 = arith.constant 0 : index
    %c0_37 = arith.constant 0 : index
    %38 = vector.load %arg1[%c0_35, %c0_36, %c0_37] : memref<4x16x16xf32, #tpu.memory_space<vmem>>, vector<1x16x16xf32>
    %39 = vector.shape_cast %38 : vector<1x16x16xf32> to vector<16x16xf32>
    %40 = vector.extract_strided_slice %37 {offsets = [0, 0], sizes = [16, 16], strides = [1, 1]} : vector<64x16xf32> to vector<16x16xf32>
    %cst_38 = arith.constant dense<0.000000e+00> : vector<16x16xf32>
    %41 = tpu.matmul %39, %40, %cst_38 {dimension_numbers = #tpu.dot_dimension_numbers<[1], [0], [0], [1], [0, 0, 1, 1], [], []>} : vector<16x16xf32>, vector<16x16xf32>, vector<16x16xf32> -> vector<16x16xf32>
    %c0_39 = arith.constant 0 : index
    %c0_40 = arith.constant 0 : index
    %42 = vector.load %arg18[%c0_39, %c0_40] : memref<64x16xf32, #tpu.memory_space<vmem>>, vector<16x16xf32>
    tpu.vector_store %arg18[%c0_39, %c0_40], %41 {strides = array<i32>} : memref<64x16xf32, #tpu.memory_space<vmem>>, vector<16x16xf32>,
    %c1_41 = arith.constant 1 : index
    %c0_42 = arith.constant 0 : index
    %c0_43 = arith.constant 0 : index
    %43 = vector.load %arg1[%c1_41, %c0_42, %c0_43] : memref<4x16x16xf32, #tpu.memory_space<vmem>>, vector<1x16x16xf32>
    %44 = vector.shape_cast %43 : vector<1x16x16xf32> to vector<16x16xf32>
    %45 = vector.extract_strided_slice %37 {offsets = [16, 0], sizes = [16, 16], strides = [1, 1]} : vector<64x16xf32> to vector<16x16xf32>
    %cst_44 = arith.constant dense<0.000000e+00> : vector<16x16xf32>
    %46 = tpu.matmul %44, %45, %cst_44 {dimension_numbers = #tpu.dot_dimension_numbers<[1], [0], [0], [1], [0, 0, 1, 1], [], []>} : vector<16x16xf32>, vector<16x16xf32>, vector<16x16xf32> -> vector<16x16xf32>
    %c16_45 = arith.constant 16 : index
    %c0_46 = arith.constant 0 : index
    %47 = vector.load %arg18[%c16_45, %c0_46] : memref<64x16xf32, #tpu.memory_space<vmem>>, vector<16x16xf32>
    tpu.vector_store %arg18[%c16_45, %c0_46], %46 {strides = array<i32>} : memref<64x16xf32, #tpu.memory_space<vmem>>, vector<16x16xf32>,
    %c2_47 = arith.constant 2 : index
    %c0_48 = arith.constant 0 : index
    %c0_49 = arith.constant 0 : index
    %48 = vector.load %arg1[%c2_47, %c0_48, %c0_49] : memref<4x16x16xf32, #tpu.memory_space<vmem>>, vector<1x16x16xf32>
    %49 = vector.shape_cast %48 : vector<1x16x16xf32> to vector<16x16xf32>
    %50 = vector.extract_strided_slice %37 {offsets = [32, 0], sizes = [16, 16], strides = [1, 1]} : vector<64x16xf32> to vector<16x16xf32>
    %cst_50 = arith.constant dense<0.000000e+00> : vector<16x16xf32>
    %51 = tpu.matmul %49, %50, %cst_50 {dimension_numbers = #tpu.dot_dimension_numbers<[1], [0], [0], [1], [0, 0, 1, 1], [], []>} : vector<16x16xf32>, vector<16x16xf32>, vector<16x16xf32> -> vector<16x16xf32>
    %c32_51 = arith.constant 32 : index
    %c0_52 = arith.constant 0 : index
    %52 = vector.load %arg18[%c32_51, %c0_52] : memref<64x16xf32, #tpu.memory_space<vmem>>, vector<16x16xf32>
    tpu.vector_store %arg18[%c32_51, %c0_52], %51 {strides = array<i32>} : memref<64x16xf32, #tpu.memory_space<vmem>>, vector<16x16xf32>,
    %c3_53 = arith.constant 3 : index
    %c0_54 = arith.constant 0 : index
    %c0_55 = arith.constant 0 : index
    %53 = vector.load %arg1[%c3_53, %c0_54, %c0_55] : memref<4x16x16xf32, #tpu.memory_space<vmem>>, vector<1x16x16xf32>
    %54 = vector.shape_cast %53 : vector<1x16x16xf32> to vector<16x16xf32>
    %55 = vector.extract_strided_slice %37 {offsets = [48, 0], sizes = [16, 16], strides = [1, 1]} : vector<64x16xf32> to vector<16x16xf32>
    %cst_56 = arith.constant dense<0.000000e+00> : vector<16x16xf32>
    %56 = tpu.matmul %54, %55, %cst_56 {dimension_numbers = #tpu.dot_dimension_numbers<[1], [0], [0], [1], [0, 0, 1, 1], [], []>} : vector<16x16xf32>, vector<16x16xf32>, vector<16x16xf32> -> vector<16x16xf32>
    %c48_57 = arith.constant 48 : index
    %c0_58 = arith.constant 0 : index
    %57 = vector.load %arg18[%c48_57, %c0_58] : memref<64x16xf32, #tpu.memory_space<vmem>>, vector<16x16xf32>
    tpu.vector_store %arg18[%c48_57, %c0_58], %56 {strides = array<i32>} : memref<64x16xf32, #tpu.memory_space<vmem>>, vector<16x16xf32>,
    %c0_59 = arith.constant 0 : index
    %c0_60 = arith.constant 0 : index
    %58 = vector.load %arg18[%c0_59, %c0_60] : memref<64x16xf32, #tpu.memory_space<vmem>>, vector<64x16xf32>
    %c0_61 = arith.constant 0 : index
    %c0_62 = arith.constant 0 : index
    %59 = vector.load %arg9[%c0_61, %c0_62] : memref<1x16xf32, #tpu.memory_space<vmem>>, vector<1x16xf32>
    %60 = vector.broadcast %59 : vector<1x16xf32> to vector<64x16xf32>
    %61 = arith.addf %58, %60 : vector<64x16xf32>
    %cst_63 = arith.constant 0.000000e+00 : f32
    %62 = vector.broadcast %cst_63 : f32 to vector<64x16xf32>
    %63 = arith.maximumf %61, %62 : vector<64x16xf32>
    %c0_64 = arith.constant 0 : index
    %c0_65 = arith.constant 0 : index
    %64 = vector.load %arg10[%c0_64, %c0_65] : memref<16x16xf32, #tpu.memory_space<vmem>>, vector<16x16xf32>
    %cst_66 = arith.constant dense<0.000000e+00> : vector<64x16xf32>
    %65 = tpu.matmul %63, %64, %cst_66 {dimension_numbers = #tpu.dot_dimension_numbers<[1], [0], [0], [1], [0, 0, 1, 1], [], []>} : vector<64x16xf32>, vector<16x16xf32>, vector<64x16xf32> -> vector<64x16xf32>
    %c0_67 = arith.constant 0 : index
    %c0_68 = arith.constant 0 : index
    %66 = vector.load %arg11[%c0_67, %c0_68] : memref<1x16xf32, #tpu.memory_space<vmem>>, vector<1x16xf32>
    %67 = vector.broadcast %66 : vector<1x16xf32> to vector<64x16xf32>
    %68 = arith.addf %65, %67 : vector<64x16xf32>
    %c0_69 = arith.constant 0 : index
    %c0_70 = arith.constant 0 : index
    %69 = vector.load %arg12[%c0_69, %c0_70] : memref<16x16xf32, #tpu.memory_space<vmem>>, vector<16x16xf32>
    %cst_71 = arith.constant dense<0.000000e+00> : vector<64x16xf32>
    %70 = tpu.matmul %68, %69, %cst_71 {dimension_numbers = #tpu.dot_dimension_numbers<[1], [0], [0], [1], [0, 0, 1, 1], [], []>} : vector<64x16xf32>, vector<16x16xf32>, vector<64x16xf32> -> vector<64x16xf32>
    %c0_72 = arith.constant 0 : index
    %c0_73 = arith.constant 0 : index
    %c0_74 = arith.constant 0 : index
    %71 = vector.load %arg2[%c0_72, %c0_73, %c0_74] : memref<4x16x16xf32, #tpu.memory_space<vmem>>, vector<1x16x16xf32>
    %72 = vector.shape_cast %71 : vector<1x16x16xf32> to vector<16x16xf32>
    %73 = vector.extract_strided_slice %70 {offsets = [0, 0], sizes = [16, 16], strides = [1, 1]} : vector<64x16xf32> to vector<16x16xf32>
    %cst_75 = arith.constant dense<0.000000e+00> : vector<16x16xf32>
    %74 = tpu.matmul %72, %73, %cst_75 {dimension_numbers = #tpu.dot_dimension_numbers<[1], [0], [0], [1], [0, 0, 1, 1], [], []>} : vector<16x16xf32>, vector<16x16xf32>, vector<16x16xf32> -> vector<16x16xf32>
    %c0_76 = arith.constant 0 : index
    %c0_77 = arith.constant 0 : index
    %75 = vector.load %arg18[%c0_76, %c0_77] : memref<64x16xf32, #tpu.memory_space<vmem>>, vector<16x16xf32>
    tpu.vector_store %arg18[%c0_76, %c0_77], %74 {strides = array<i32>} : memref<64x16xf32, #tpu.memory_space<vmem>>, vector<16x16xf32>,
    %c1_78 = arith.constant 1 : index
    %c0_79 = arith.constant 0 : index
    %c0_80 = arith.constant 0 : index
    %76 = vector.load %arg2[%c1_78, %c0_79, %c0_80] : memref<4x16x16xf32, #tpu.memory_space<vmem>>, vector<1x16x16xf32>
    %77 = vector.shape_cast %76 : vector<1x16x16xf32> to vector<16x16xf32>
    %78 = vector.extract_strided_slice %70 {offsets = [16, 0], sizes = [16, 16], strides = [1, 1]} : vector<64x16xf32> to vector<16x16xf32>
    %cst_81 = arith.constant dense<0.000000e+00> : vector<16x16xf32>
    %79 = tpu.matmul %77, %78, %cst_81 {dimension_numbers = #tpu.dot_dimension_numbers<[1], [0], [0], [1], [0, 0, 1, 1], [], []>} : vector<16x16xf32>, vector<16x16xf32>, vector<16x16xf32> -> vector<16x16xf32>
    %c16_82 = arith.constant 16 : index
    %c0_83 = arith.constant 0 : index
    %80 = vector.load %arg18[%c16_82, %c0_83] : memref<64x16xf32, #tpu.memory_space<vmem>>, vector<16x16xf32>
    tpu.vector_store %arg18[%c16_82, %c0_83], %79 {strides = array<i32>} : memref<64x16xf32, #tpu.memory_space<vmem>>, vector<16x16xf32>,
    %c2_84 = arith.constant 2 : index
    %c0_85 = arith.constant 0 : index
    %c0_86 = arith.constant 0 : index
    %81 = vector.load %arg2[%c2_84, %c0_85, %c0_86] : memref<4x16x16xf32, #tpu.memory_space<vmem>>, vector<1x16x16xf32>
    %82 = vector.shape_cast %81 : vector<1x16x16xf32> to vector<16x16xf32>
    %83 = vector.extract_strided_slice %70 {offsets = [32, 0], sizes = [16, 16], strides = [1, 1]} : vector<64x16xf32> to vector<16x16xf32>
    %cst_87 = arith.constant dense<0.000000e+00> : vector<16x16xf32>
    %84 = tpu.matmul %82, %83, %cst_87 {dimension_numbers = #tpu.dot_dimension_numbers<[1], [0], [0], [1], [0, 0, 1, 1], [], []>} : vector<16x16xf32>, vector<16x16xf32>, vector<16x16xf32> -> vector<16x16xf32>
    %c32_88 = arith.constant 32 : index
    %c0_89 = arith.constant 0 : index
    %85 = vector.load %arg18[%c32_88, %c0_89] : memref<64x16xf32, #tpu.memory_space<vmem>>, vector<16x16xf32>
    tpu.vector_store %arg18[%c32_88, %c0_89], %84 {strides = array<i32>} : memref<64x16xf32, #tpu.memory_space<vmem>>, vector<16x16xf32>,
    %c3_90 = arith.constant 3 : index
    %c0_91 = arith.constant 0 : index
    %c0_92 = arith.constant 0 : index
    %86 = vector.load %arg2[%c3_90, %c0_91, %c0_92] : memref<4x16x16xf32, #tpu.memory_space<vmem>>, vector<1x16x16xf32>
    %87 = vector.shape_cast %86 : vector<1x16x16xf32> to vector<16x16xf32>
    %88 = vector.extract_strided_slice %70 {offsets = [48, 0], sizes = [16, 16], strides = [1, 1]} : vector<64x16xf32> to vector<16x16xf32>
    %cst_93 = arith.constant dense<0.000000e+00> : vector<16x16xf32>
    %89 = tpu.matmul %87, %88, %cst_93 {dimension_numbers = #tpu.dot_dimension_numbers<[1], [0], [0], [1], [0, 0, 1, 1], [], []>} : vector<16x16xf32>, vector<16x16xf32>, vector<16x16xf32> -> vector<16x16xf32>
    %c48_94 = arith.constant 48 : index
    %c0_95 = arith.constant 0 : index
    %90 = vector.load %arg18[%c48_94, %c0_95] : memref<64x16xf32, #tpu.memory_space<vmem>>, vector<16x16xf32>
    tpu.vector_store %arg18[%c48_94, %c0_95], %89 {strides = array<i32>} : memref<64x16xf32, #tpu.memory_space<vmem>>, vector<16x16xf32>,
    %c0_96 = arith.constant 0 : index
    %c0_97 = arith.constant 0 : index
    %91 = vector.load %arg18[%c0_96, %c0_97] : memref<64x16xf32, #tpu.memory_space<vmem>>, vector<64x16xf32>
    %c0_98 = arith.constant 0 : index
    %c0_99 = arith.constant 0 : index
    %92 = vector.load %arg13[%c0_98, %c0_99] : memref<1x16xf32, #tpu.memory_space<vmem>>, vector<1x16xf32>
    %93 = vector.broadcast %92 : vector<1x16xf32> to vector<64x16xf32>
    %94 = arith.addf %91, %93 : vector<64x16xf32>
    %cst_100 = arith.constant 0.000000e+00 : f32
    %95 = vector.broadcast %cst_100 : f32 to vector<64x16xf32>
    %96 = arith.maximumf %94, %95 : vector<64x16xf32>
    %c0_101 = arith.constant 0 : index
    %c0_102 = arith.constant 0 : index
    %97 = vector.load %arg14[%c0_101, %c0_102] : memref<16x16xf32, #tpu.memory_space<vmem>>, vector<16x16xf32>
    %cst_103 = arith.constant dense<0.000000e+00> : vector<64x16xf32>
    %98 = tpu.matmul %68, %97, %cst_103 {dimension_numbers = #tpu.dot_dimension_numbers<[1], [0], [0], [1], [0, 0, 1, 1], [], []>} : vector<64x16xf32>, vector<16x16xf32>, vector<64x16xf32> -> vector<64x16xf32>
    %c0_104 = arith.constant 0 : index
    %c0_105 = arith.constant 0 : index
    %c0_106 = arith.constant 0 : index
    %99 = vector.load %arg2[%c0_104, %c0_105, %c0_106] : memref<4x16x16xf32, #tpu.memory_space<vmem>>, vector<1x16x16xf32>
    %100 = vector.shape_cast %99 : vector<1x16x16xf32> to vector<16x16xf32>
    %101 = vector.extract_strided_slice %98 {offsets = [0, 0], sizes = [16, 16], strides = [1, 1]} : vector<64x16xf32> to vector<16x16xf32>
    %cst_107 = arith.constant dense<0.000000e+00> : vector<16x16xf32>
    %102 = tpu.matmul %100, %101, %cst_107 {dimension_numbers = #tpu.dot_dimension_numbers<[1], [0], [0], [1], [0, 0, 1, 1], [], []>} : vector<16x16xf32>, vector<16x16xf32>, vector<16x16xf32> -> vector<16x16xf32>
    %c0_108 = arith.constant 0 : index
    %c0_109 = arith.constant 0 : index
    %103 = vector.load %arg18[%c0_108, %c0_109] : memref<64x16xf32, #tpu.memory_space<vmem>>, vector<16x16xf32>
    tpu.vector_store %arg18[%c0_108, %c0_109], %102 {strides = array<i32>} : memref<64x16xf32, #tpu.memory_space<vmem>>, vector<16x16xf32>,
    %c1_110 = arith.constant 1 : index
    %c0_111 = arith.constant 0 : index
    %c0_112 = arith.constant 0 : index
    %104 = vector.load %arg2[%c1_110, %c0_111, %c0_112] : memref<4x16x16xf32, #tpu.memory_space<vmem>>, vector<1x16x16xf32>
    %105 = vector.shape_cast %104 : vector<1x16x16xf32> to vector<16x16xf32>
    %106 = vector.extract_strided_slice %98 {offsets = [16, 0], sizes = [16, 16], strides = [1, 1]} : vector<64x16xf32> to vector<16x16xf32>
    %cst_113 = arith.constant dense<0.000000e+00> : vector<16x16xf32>
    %107 = tpu.matmul %105, %106, %cst_113 {dimension_numbers = #tpu.dot_dimension_numbers<[1], [0], [0], [1], [0, 0, 1, 1], [], []>} : vector<16x16xf32>, vector<16x16xf32>, vector<16x16xf32> -> vector<16x16xf32>
    %c16_114 = arith.constant 16 : index
    %c0_115 = arith.constant 0 : index
    %108 = vector.load %arg18[%c16_114, %c0_115] : memref<64x16xf32, #tpu.memory_space<vmem>>, vector<16x16xf32>
    tpu.vector_store %arg18[%c16_114, %c0_115], %107 {strides = array<i32>} : memref<64x16xf32, #tpu.memory_space<vmem>>, vector<16x16xf32>,
    %c2_116 = arith.constant 2 : index
    %c0_117 = arith.constant 0 : index
    %c0_118 = arith.constant 0 : index
    %109 = vector.load %arg2[%c2_116, %c0_117, %c0_118] : memref<4x16x16xf32, #tpu.memory_space<vmem>>, vector<1x16x16xf32>
    %110 = vector.shape_cast %109 : vector<1x16x16xf32> to vector<16x16xf32>
    %111 = vector.extract_strided_slice %98 {offsets = [32, 0], sizes = [16, 16], strides = [1, 1]} : vector<64x16xf32> to vector<16x16xf32>
    %cst_119 = arith.constant dense<0.000000e+00> : vector<16x16xf32>
    %112 = tpu.matmul %110, %111, %cst_119 {dimension_numbers = #tpu.dot_dimension_numbers<[1], [0], [0], [1], [0, 0, 1, 1], [], []>} : vector<16x16xf32>, vector<16x16xf32>, vector<16x16xf32> -> vector<16x16xf32>
    %c32_120 = arith.constant 32 : index
    %c0_121 = arith.constant 0 : index
    %113 = vector.load %arg18[%c32_120, %c0_121] : memref<64x16xf32, #tpu.memory_space<vmem>>, vector<16x16xf32>
    tpu.vector_store %arg18[%c32_120, %c0_121], %112 {strides = array<i32>} : memref<64x16xf32, #tpu.memory_space<vmem>>, vector<16x16xf32>,
    %c3_122 = arith.constant 3 : index
    %c0_123 = arith.constant 0 : index
    %c0_124 = arith.constant 0 : index
    %114 = vector.load %arg2[%c3_122, %c0_123, %c0_124] : memref<4x16x16xf32, #tpu.memory_space<vmem>>, vector<1x16x16xf32>
    %115 = vector.shape_cast %114 : vector<1x16x16xf32> to vector<16x16xf32>
    %116 = vector.extract_strided_slice %98 {offsets = [48, 0], sizes = [16, 16], strides = [1, 1]} : vector<64x16xf32> to vector<16x16xf32>
    %cst_125 = arith.constant dense<0.000000e+00> : vector<16x16xf32>
    %117 = tpu.matmul %115, %116, %cst_125 {dimension_numbers = #tpu.dot_dimension_numbers<[1], [0], [0], [1], [0, 0, 1, 1], [], []>} : vector<16x16xf32>, vector<16x16xf32>, vector<16x16xf32> -> vector<16x16xf32>
    %c48_126 = arith.constant 48 : index
    %c0_127 = arith.constant 0 : index
    %118 = vector.load %arg18[%c48_126, %c0_127] : memref<64x16xf32, #tpu.memory_space<vmem>>, vector<16x16xf32>
    tpu.vector_store %arg18[%c48_126, %c0_127], %117 {strides = array<i32>} : memref<64x16xf32, #tpu.memory_space<vmem>>, vector<16x16xf32>,
    %c0_128 = arith.constant 0 : index
    %c0_129 = arith.constant 0 : index
    %119 = vector.load %arg18[%c0_128, %c0_129] : memref<64x16xf32, #tpu.memory_space<vmem>>, vector<64x16xf32>
    %c0_130 = arith.constant 0 : index
    %c0_131 = arith.constant 0 : index
    %120 = vector.load %arg15[%c0_130, %c0_131] : memref<1x16xf32, #tpu.memory_space<vmem>>, vector<1x16xf32>
    %121 = vector.broadcast %120 : vector<1x16xf32> to vector<64x16xf32>
    %122 = arith.addf %119, %121 : vector<64x16xf32>
    %cst_132 = arith.constant 0.000000e+00 : f32
    %123 = vector.broadcast %cst_132 : f32 to vector<64x16xf32>
    %124 = arith.maximumf %122, %123 : vector<64x16xf32>
    %c0_133 = arith.constant 0 : index
    %c0_134 = arith.constant 0 : index
    %125 = vector.load %arg3[%c0_133, %c0_134] : memref<64x16xf32, #tpu.memory_space<vmem>>, vector<64x16xf32>
    %126 = math.exp %124 : vector<64x16xf32>
    %127 = arith.mulf %125, %126 : vector<64x16xf32>
    %128 = arith.addf %96, %127 : vector<64x16xf32>
    %c0_135 = arith.constant 0 : index
    %c0_136 = arith.constant 0 : index
    %129 = vector.load %arg16[%c0_135, %c0_136] : memref<64x16xf32, #tpu.memory_space<vmem>>, vector<64x16xf32>
    tpu.vector_store %arg16[%c0_135, %c0_136], %128 {strides = array<i32>} : memref<64x16xf32, #tpu.memory_space<vmem>>, vector<64x16xf32>,
    %130 = vector.extract_strided_slice %128 {offsets = [0, 0], sizes = [16, 16], strides = [1, 1]} : vector<64x16xf32> to vector<16x16xf32>
    %131 = tpu.transpose %130, [1, 0] : vector<16x16xf32> -> vector<16x16xf32>
    %cst_137 = arith.constant dense<0.000000e+00> : vector<16x16xf32>
    %132 = tpu.matmul %130, %131, %cst_137 {dimension_numbers = #tpu.dot_dimension_numbers<[1], [0], [0], [1], [0, 0, 1, 1], [], []>} : vector<16x16xf32>, vector<16x16xf32>, vector<16x16xf32> -> vector<16x16xf32>
    %c0_138 = arith.constant 0 : index
    %c0_139 = arith.constant 0 : index
    %c0_140 = arith.constant 0 : index
    %133 = vector.load %arg17[%c0_138, %c0_139, %c0_140] : memref<4x16x16xf32, #tpu.memory_space<vmem>>, vector<1x16x16xf32>
    %134 = vector.shape_cast %133 : vector<1x16x16xf32> to vector<16x16xf32>
    %135 = vector.shape_cast %132 : vector<16x16xf32> to vector<1x16x16xf32>
    tpu.vector_store %arg17[%c0_138, %c0_139, %c0_140], %135 {strides = array<i32>} : memref<4x16x16xf32, #tpu.memory_space<vmem>>, vector<1x16x16xf32>,
    %136 = vector.extract_strided_slice %128 {offsets = [16, 0], sizes = [16, 16], strides = [1, 1]} : vector<64x16xf32> to vector<16x16xf32>
    %137 = tpu.transpose %136, [1, 0] : vector<16x16xf32> -> vector<16x16xf32>
    %cst_141 = arith.constant dense<0.000000e+00> : vector<16x16xf32>
    %138 = tpu.matmul %136, %137, %cst_141 {dimension_numbers = #tpu.dot_dimension_numbers<[1], [0], [0], [1], [0, 0, 1, 1], [], []>} : vector<16x16xf32>, vector<16x16xf32>, vector<16x16xf32> -> vector<16x16xf32>
    %c1_142 = arith.constant 1 : index
    %c0_143 = arith.constant 0 : index
    %c0_144 = arith.constant 0 : index
    %139 = vector.load %arg17[%c1_142, %c0_143, %c0_144] : memref<4x16x16xf32, #tpu.memory_space<vmem>>, vector<1x16x16xf32>
    %140 = vector.shape_cast %139 : vector<1x16x16xf32> to vector<16x16xf32>
    %141 = vector.shape_cast %138 : vector<16x16xf32> to vector<1x16x16xf32>
    tpu.vector_store %arg17[%c1_142, %c0_143, %c0_144], %141 {strides = array<i32>} : memref<4x16x16xf32, #tpu.memory_space<vmem>>, vector<1x16x16xf32>,
    %142 = vector.extract_strided_slice %128 {offsets = [32, 0], sizes = [16, 16], strides = [1, 1]} : vector<64x16xf32> to vector<16x16xf32>
    %143 = tpu.transpose %142, [1, 0] : vector<16x16xf32> -> vector<16x16xf32>
    %cst_145 = arith.constant dense<0.000000e+00> : vector<16x16xf32>
    %144 = tpu.matmul %142, %143, %cst_145 {dimension_numbers = #tpu.dot_dimension_numbers<[1], [0], [0], [1], [0, 0, 1, 1], [], []>} : vector<16x16xf32>, vector<16x16xf32>, vector<16x16xf32> -> vector<16x16xf32>
    %c2_146 = arith.constant 2 : index
    %c0_147 = arith.constant 0 : index
    %c0_148 = arith.constant 0 : index
    %145 = vector.load %arg17[%c2_146, %c0_147, %c0_148] : memref<4x16x16xf32, #tpu.memory_space<vmem>>, vector<1x16x16xf32>
    %146 = vector.shape_cast %145 : vector<1x16x16xf32> to vector<16x16xf32>
    %147 = vector.shape_cast %144 : vector<16x16xf32> to vector<1x16x16xf32>
    tpu.vector_store %arg17[%c2_146, %c0_147, %c0_148], %147 {strides = array<i32>} : memref<4x16x16xf32, #tpu.memory_space<vmem>>, vector<1x16x16xf32>,
    %148 = vector.extract_strided_slice %128 {offsets = [48, 0], sizes = [16, 16], strides = [1, 1]} : vector<64x16xf32> to vector<16x16xf32>
    %149 = tpu.transpose %148, [1, 0] : vector<16x16xf32> -> vector<16x16xf32>
    %cst_149 = arith.constant dense<0.000000e+00> : vector<16x16xf32>
    %150 = tpu.matmul %148, %149, %cst_149 {dimension_numbers = #tpu.dot_dimension_numbers<[1], [0], [0], [1], [0, 0, 1, 1], [], []>} : vector<16x16xf32>, vector<16x16xf32>, vector<16x16xf32> -> vector<16x16xf32>
    %c3_150 = arith.constant 3 : index
    %c0_151 = arith.constant 0 : index
    %c0_152 = arith.constant 0 : index
    %151 = vector.load %arg17[%c3_150, %c0_151, %c0_152] : memref<4x16x16xf32, #tpu.memory_space<vmem>>, vector<1x16x16xf32>
    %152 = vector.shape_cast %151 : vector<1x16x16xf32> to vector<16x16xf32>
    %153 = vector.shape_cast %150 : vector<16x16xf32> to vector<1x16x16xf32>
    tpu.vector_store %arg17[%c3_150, %c0_151, %c0_152], %153 {strides = array<i32>} : memref<4x16x16xf32, #tpu.memory_space<vmem>>, vector<1x16x16xf32>,
    return
  }
}

module attributes {stable_mosaic.version = 11 : i64} {
  func.func @_classifier_kernel(%arg0: memref<4x256xf32, #tpu.memory_space<vmem>>, %arg1: memref<4x256xf32, #tpu.memory_space<vmem>>, %arg2: memref<256x64xf32, #tpu.memory_space<vmem>>, %arg3: memref<1x64xf32, #tpu.memory_space<vmem>>, %arg4: memref<1x64xf32, #tpu.memory_space<vmem>>, %arg5: memref<1x64xf32, #tpu.memory_space<vmem>>, %arg6: memref<64x128xf32, #tpu.memory_space<vmem>>, %arg7: memref<1x128xf32, #tpu.memory_space<vmem>>, %arg8: memref<1x128xf32, #tpu.memory_space<vmem>>, %arg9: memref<1x128xf32, #tpu.memory_space<vmem>>, %arg10: memref<128x2xf32, #tpu.memory_space<vmem>>, %arg11: memref<1x2xf32, #tpu.memory_space<vmem>>, %arg12: memref<4x2xf32, #tpu.memory_space<vmem>>) attributes {dimension_semantics = [], scalar_prefetch = 0 : i64, scratch_operands = 0 : i64, tpu.core_type = #tpu.core_type<tc>} {
    %c0 = arith.constant 0 : index
    %c0_0 = arith.constant 0 : index
    %0 = vector.load %arg0[%c0, %c0_0] : memref<4x256xf32, #tpu.memory_space<vmem>>, vector<4x256xf32>
    %c0_1 = arith.constant 0 : index
    %c0_2 = arith.constant 0 : index
    %1 = vector.load %arg1[%c0_1, %c0_2] : memref<4x256xf32, #tpu.memory_space<vmem>>, vector<4x256xf32>
    %2 = arith.mulf %0, %1 : vector<4x256xf32>
    %c0_3 = arith.constant 0 : index
    %c0_4 = arith.constant 0 : index
    %3 = vector.load %arg2[%c0_3, %c0_4] : memref<256x64xf32, #tpu.memory_space<vmem>>, vector<256x64xf32>
    %cst = arith.constant dense<0.000000e+00> : vector<4x64xf32>
    %4 = tpu.matmul %2, %3, %cst {dimension_numbers = #tpu.dot_dimension_numbers<[1], [0], [0], [1], [0, 0, 1, 1], [], []>} : vector<4x256xf32>, vector<256x64xf32>, vector<4x64xf32> -> vector<4x64xf32>
    %c0_5 = arith.constant 0 : index
    %c0_6 = arith.constant 0 : index
    %5 = vector.load %arg3[%c0_5, %c0_6] : memref<1x64xf32, #tpu.memory_space<vmem>>, vector<1x64xf32>
    %6 = vector.broadcast %5 : vector<1x64xf32> to vector<4x64xf32>
    %7 = arith.addf %4, %6 : vector<4x64xf32>
    %cst_7 = arith.constant 0.000000e+00 : f32
    %8 = vector.broadcast %cst_7 : f32 to vector<4x64xf32>
    %9 = arith.maximumf %7, %8 : vector<4x64xf32>
    %c0_8 = arith.constant 0 : index
    %c0_9 = arith.constant 0 : index
    %10 = vector.load %arg4[%c0_8, %c0_9] : memref<1x64xf32, #tpu.memory_space<vmem>>, vector<1x64xf32>
    %11 = vector.broadcast %10 : vector<1x64xf32> to vector<4x64xf32>
    %12 = arith.mulf %9, %11 : vector<4x64xf32>
    %c0_10 = arith.constant 0 : index
    %c0_11 = arith.constant 0 : index
    %13 = vector.load %arg5[%c0_10, %c0_11] : memref<1x64xf32, #tpu.memory_space<vmem>>, vector<1x64xf32>
    %14 = vector.broadcast %13 : vector<1x64xf32> to vector<4x64xf32>
    %15 = arith.addf %12, %14 : vector<4x64xf32>
    %c0_12 = arith.constant 0 : index
    %c0_13 = arith.constant 0 : index
    %16 = vector.load %arg6[%c0_12, %c0_13] : memref<64x128xf32, #tpu.memory_space<vmem>>, vector<64x128xf32>
    %cst_14 = arith.constant dense<0.000000e+00> : vector<4x128xf32>
    %17 = tpu.matmul %15, %16, %cst_14 {dimension_numbers = #tpu.dot_dimension_numbers<[1], [0], [0], [1], [0, 0, 1, 1], [], []>} : vector<4x64xf32>, vector<64x128xf32>, vector<4x128xf32> -> vector<4x128xf32>
    %c0_15 = arith.constant 0 : index
    %c0_16 = arith.constant 0 : index
    %18 = vector.load %arg7[%c0_15, %c0_16] : memref<1x128xf32, #tpu.memory_space<vmem>>, vector<1x128xf32>
    %19 = vector.broadcast %18 : vector<1x128xf32> to vector<4x128xf32>
    %20 = arith.addf %17, %19 : vector<4x128xf32>
    %cst_17 = arith.constant 0.000000e+00 : f32
    %21 = vector.broadcast %cst_17 : f32 to vector<4x128xf32>
    %22 = arith.maximumf %20, %21 : vector<4x128xf32>
    %c0_18 = arith.constant 0 : index
    %c0_19 = arith.constant 0 : index
    %23 = vector.load %arg8[%c0_18, %c0_19] : memref<1x128xf32, #tpu.memory_space<vmem>>, vector<1x128xf32>
    %24 = vector.broadcast %23 : vector<1x128xf32> to vector<4x128xf32>
    %25 = arith.mulf %22, %24 : vector<4x128xf32>
    %c0_20 = arith.constant 0 : index
    %c0_21 = arith.constant 0 : index
    %26 = vector.load %arg9[%c0_20, %c0_21] : memref<1x128xf32, #tpu.memory_space<vmem>>, vector<1x128xf32>
    %27 = vector.broadcast %26 : vector<1x128xf32> to vector<4x128xf32>
    %28 = arith.addf %25, %27 : vector<4x128xf32>
    %c0_22 = arith.constant 0 : index
    %c0_23 = arith.constant 0 : index
    %29 = vector.load %arg10[%c0_22, %c0_23] : memref<128x2xf32, #tpu.memory_space<vmem>>, vector<128x2xf32>
    %cst_24 = arith.constant dense<0.000000e+00> : vector<4x2xf32>
    %30 = tpu.matmul %28, %29, %cst_24 {dimension_numbers = #tpu.dot_dimension_numbers<[1], [0], [0], [1], [0, 0, 1, 1], [], []>} : vector<4x128xf32>, vector<128x2xf32>, vector<4x2xf32> -> vector<4x2xf32>
    %c0_25 = arith.constant 0 : index
    %c0_26 = arith.constant 0 : index
    %31 = vector.load %arg11[%c0_25, %c0_26] : memref<1x2xf32, #tpu.memory_space<vmem>>, vector<1x2xf32>
    %32 = vector.broadcast %31 : vector<1x2xf32> to vector<4x2xf32>
    %33 = arith.addf %30, %32 : vector<4x2xf32>
    %cst_27 = arith.constant dense<0xFF800000> : vector<4xf32>
    %34 = vector.multi_reduction <maximumf>, %33, %cst_27 [1] : vector<4x2xf32> to vector<4xf32>
    %35 = vector.shape_cast %34 : vector<4xf32> to vector<4x1xf32>
    %36 = vector.broadcast %35 : vector<4x1xf32> to vector<4x2xf32>
    %37 = arith.subf %33, %36 : vector<4x2xf32>
    %38 = math.exp %37 : vector<4x2xf32>
    %cst_28 = arith.constant dense<0.000000e+00> : vector<4xf32>
    %39 = vector.multi_reduction <add>, %38, %cst_28 [1] : vector<4x2xf32> to vector<4xf32>
    %40 = vector.shape_cast %39 : vector<4xf32> to vector<4x1xf32>
    %41 = math.log %40 : vector<4x1xf32>
    %42 = arith.addf %35, %41 : vector<4x1xf32>
    %43 = vector.broadcast %42 : vector<4x1xf32> to vector<4x2xf32>
    %44 = arith.subf %33, %43 : vector<4x2xf32>
    %c0_29 = arith.constant 0 : index
    %c0_30 = arith.constant 0 : index
    %45 = vector.load %arg12[%c0_29, %c0_30] : memref<4x2xf32, #tpu.memory_space<vmem>>, vector<4x2xf32>
    tpu.vector_store %arg12[%c0_29, %c0_30], %44 {strides = array<i32>} : memref<4x2xf32, #tpu.memory_space<vmem>>, vector<4x2xf32>,
    return
  }
}

</mosaic_0001>

<bundles_post_ra>
// kernel: neurosparse_forward.3
= control target key start
LH: loop header
LB: loop body
LE: loop exit
PB: predicated region body
PF: predicated region fallthrough
CT: control target
= control target key end

     0   :  { %v589_v3 = vmov 0.0|0.0   ;;  %vm590_vm0 = vmmov 0   ;;  %vm188_vm1 = vcmask 523264   ;;  %vm372_vm2 = vcmask 11264   ;;  %s872_s2 = inlined_call_operand.vmem [shape: f32[256,64], index: 2, kind: input, shape index: {}]   ;;  %s873_s0 = inlined_call_operand.vmem [shape: f32[4,256], index: 0, kind: input, shape index: {}]   ;;  %s874_s1 = inlined_call_operand.vmem [shape: f32[4,256], index: 1, kind: input, shape index: {}]   ;;  %s875_s6 = inlined_call_operand.vmem [shape: f32[64,128], index: 6, kind: input, shape index: {}]   ;;  %s876_s3 = inlined_call_operand.vmem [shape: f32[1,64], index: 3, kind: input, shape index: {}]   ;;  %s877_s4 = inlined_call_operand.vmem [shape: f32[1,64], index: 4, kind: input, shape index: {}]   ;;  %s878_s10 = inlined_call_operand.vmem [shape: f32[128,2], index: 10, kind: input, shape index: {}]   ;;  %s879_s5 = inlined_call_operand.vmem [shape: f32[1,64], index: 5, kind: input, shape index: {}]   ;;  %s880_s7 = inlined_call_operand.vmem [shape: f32[1,128], index: 7, kind: input, shape index: {}]   ;;  %s881_s8 = inlined_call_operand.vmem [shape: f32[1,128], index: 8, kind: input, shape index: {}]   ;;  %s882_s9 = inlined_call_operand.vmem [shape: f32[1,128], index: 9, kind: input, shape index: {}]   ;;  %s883_s11 = inlined_call_operand.vmem [shape: f32[1,2], index: 11, kind: input, shape index: {}]   ;;  %s884_s12 = inlined_call_operand.vmem [shape: f32[4,2], index: 12, kind: output, shape index: {}]  }
   0x1   :  { %v60_v0 = vld [vmem:[%s872_s2 + $0x80] sm:$0xff]  ;;  %v61_v1 = vld [vmem:[%s872_s2 + $0x88] sm:$0xff]  ;;  %546 = vmatprep.subr.bf16.mxu1 %v589_v3  ;;  %v62_v6 = vld [vmem:[%s872_s2 + $0x90] sm:$0xff] }
   0x2   :  { %v44_v2 = vld [vmem:[%s872_s2] sm:$0xff]  ;;  %v514_v4 = vpack.c.bf16 %v61_v1, %v60_v0  ;;  %v45_v5 = vld [vmem:[%s872_s2 + $0x8] sm:$0xff]  ;;  %v63_v7 = vld [vmem:[%s872_s2 + $0x98] sm:$0xff]  ;;  %v591_v1 = vmov 0.0  }
   0x3   :  { %v516_v8 = vpack.c.bf16 %v45_v5, %v44_v2  ;;  %v518_v9 = vpack.c.bf16 %v63_v7, %v62_v6  ;;  %v46_v10 = vld [vmem:[%s872_s2 + $0x10] sm:$0xff]  ;;  %v47_v11 = vld [vmem:[%s872_s2 + $0x18] sm:$0xff]  ;;  %v64_v12 = vld [vmem:[%s872_s2 + $0xa0] sm:$0xff]  ;;  %476 = vmatprep.mubr.msk.f32.mxu1 %vm590_vm0, %v591_v1 }
   0x4   :  { %515 = vmatprep.subr.bf16.mxu0 %v514_v4  ;;  %v65_v13 = vld [vmem:[%s872_s2 + $0xa8] sm:$0xff]  ;;  %v520_v14 = vpack.c.bf16 %v47_v11, %v46_v10  ;;  %v48_v16 = vld [vmem:[%s872_s2 + $0x20] sm:$0xff]  ;;  %v66_v18 = vld [vmem:[%s872_s2 + $0xb0] sm:$0xff] }
   0x5   :  { %517 = vmatpush3.bf16.msra.mxu0 %v516_v8  ;;  %v522_v15 = vpack.c.bf16 %v65_v13, %v64_v12  ;;  %v49_v17 = vld [vmem:[%s872_s2 + $0x28] sm:$0xff]  ;;  %v67_v19 = vld [vmem:[%s872_s2 + $0xb8] sm:$0xff]  ;;  %v50_v22 = vld [vmem:[%s872_s2 + $0x30] sm:$0xff] }
   0x6   :  { %519 = vmatprep.subr.bf16.mxu0 %v518_v9  ;;  %v524_v20 = vpack.c.bf16 %v49_v17, %v48_v16  ;;  %v526_v21 = vpack.c.bf16 %v67_v19, %v66_v18  ;;  %v51_v23 = vld [vmem:[%s872_s2 + $0x38] sm:$0xff]  ;;  %v68_v24 = vld [vmem:[%s872_s2 + $0xc0] sm:$0xff]  ;;  %v69_v25 = vld [vmem:[%s872_s2 + $0xc8] sm:$0xff] }
   0x7   :  { %v41_v26 = vld [vmem:[%s873_s0] sm:$0xff]  ;;  %v174_v29 = vld [vmem:[%s875_s6 + $0x8] sm:$0xff]  ;;  %v528_v30 = vpack.c.bf16 %v51_v23, %v50_v22  ;;  %v530_v33 = vpack.c.bf16 %v69_v25, %v68_v24  ;;  %v70_v36 = vld [vmem:[%s872_s2 + $0xd0] sm:$0xff] }
   0x8   :  { %v42_v27 = vld [vmem:[%s874_s1] sm:$0xff]  ;;  %v53_v35 = vld [vmem:[%s872_s2 + $0x48] sm:$0xff]  ;;  %v71_v37 = vld [vmem:[%s872_s2 + $0xd8] sm:$0xff] }
   0x9   :  { %521 = vmatpush3.bf16.msra.mxu0 %v520_v14  ;;  %v173_v28 = vld [vmem:[%s875_s6] sm:$0xff]  ;;  %v43_v31 = vmul.f32 %v42_v27, %v41_v26  ;;  %v534_v40 = vpack.c.bf16 %v71_v37, %v70_v36  ;;  %v54_v41 = vld [vmem:[%s872_s2 + $0x50] sm:$0xff]  ;;  %v55_v42 = vld [vmem:[%s872_s2 + $0x58] sm:$0xff] }
   0xa   :  { %523 = vmatprep.subr.bf16.mxu0 %v522_v15  ;;  %v547_v32 = vpack.c.bf16 %v174_v29, %v173_v28  ;;  %v52_v34 = vld [vmem:[%s872_s2 + $0x40] sm:$0xff]  ;;  %v73_v44 = vld [vmem:[%s872_s2 + $0xe8] sm:$0xff]  ;;  %v536_v45 = vpack.c.bf16 %v55_v42, %v54_v41  ;;  %v74_v49 = vld [vmem:[%s872_s2 + $0xf0] sm:$0xff] }
   0xb   :  { %v84_v38 = vcombine.high %v43_v31, %v43_v31  ;;  %v532_v39 = vpack.c.bf16 %v53_v35, %v52_v34  ;;  %v72_v43 = vld [vmem:[%s872_s2 + $0xe0] sm:$0xff]  ;;  %v57_v48 = vld [vmem:[%s872_s2 + $0x68] sm:$0xff]  ;;  %v75_v50 = vld [vmem:[%s872_s2 + $0xf8] sm:$0xff] }
   0xc   :  { %548 = vmatpush3.bf16.msra.mxu1 %v547_v32  ;;  %v538_v46 = vpack.c.bf16 %v73_v44, %v72_v43  ;;  %v56_v47 = vld [vmem:[%s872_s2 + $0x60] sm:$0xff]  ;;  %v542_v52 = vpack.c.bf16 %v75_v50, %v74_v49  ;;  %v58_v53 = vld [vmem:[%s872_s2 + $0x70] sm:$0xff]  ;;  %v59_v54 = vld [vmem:[%s872_s2 + $0x78] sm:$0xff] }
   0xd   :  { %525 = vmatpush3.bf16.msra.mxu0 %v524_v20  ;;  %549 = vmatprep.subr.bf16.mxu1 %v589_v3  ;;  %v540_v51 = vpack.c.bf16 %v57_v48, %v56_v47  ;;  %v544_v55 = vpack.c.bf16 %v59_v54, %v58_v53  ;;  %v175_v56 = vld [vmem:[%s875_s6 + $0x10] sm:$0xff]  ;;  %v176_v57 = vld [vmem:[%s875_s6 + $0x18] sm:$0xff]  ;;  %v177_v59 = vld [vmem:[%s875_s6 + $0x20] sm:$0xff] }
   0xe   :  { %527 = vmatprep.subr.bf16.mxu0 %v526_v21  ;;  %150 = vmatprep.mubr.f32.mxu0 %v84_v38  ;;  %v550_v58 = vpack.c.bf16 %v176_v57, %v175_v56  ;;  %v178_v60 = vld [vmem:[%s875_s6 + $0x28] sm:$0xff]  ;;  %v179_v62 = vld [vmem:[%s875_s6 + $0x30] sm:$0xff]  ;;  %v180_v63 = vld [vmem:[%s875_s6 + $0x38] sm:$0xff] }
   0xf   :  { %v553_v61 = vpack.c.bf16 %v178_v60, %v177_v59  ;;  %v556_v0 = vpack.c.bf16 %v180_v63, %v179_v62  ;;  %v391_v4 = vld [vmem:[%s876_s3] ss:$0 sm:$0xff]  ;;  %v280_v11 = vld [vmem:[%s878_s10 + $0x8] sm:$0xff]  ;;  %v281_v16 = vld [vmem:[%s878_s10 + $0x10] sm:$0xff] }
  0x10   :  { %551 = vmatpush3.bf16.msra.mxu1 %v550_v58  ;;  %v392_v8 = vld [vmem:[%s877_s4] ss:$0 sm:$0xff]  ;;  %v282_v17 = vld [vmem:[%s878_s10 + $0x18] sm:$0xff]  ;;  %v284_v20 = vld [vmem:[%s878_s10 + $0x28] sm:$0xff] }
  0x11   :  { %529 = vmatpush3.bf16.msra.mxu0 %v528_v30  ;;  %552 = vmatprep.subr.bf16.mxu1 %v589_v3  ;;  %v279_v10 = vld [vmem:[%s878_s10] sm:$0xff]  ;;  %v562_v18 = vpack.c.bf16 %v282_v17, %v281_v16  ;;  %v285_v22 = vld [vmem:[%s878_s10 + $0x30] sm:$0xff]  ;;  %v286_v23 = vld [vmem:[%s878_s10 + $0x38] sm:$0xff] }
  0x12   :  { %531 = vmatprep.subr.bf16.mxu0 %v530_v33  ;;  %v393_v12 = vld [vmem:[%s879_s5] ss:$0 sm:$0xff]  ;;  %v559_v14 = vpack.c.bf16 %v280_v11, %v279_v10  ;;  %v568_v24 = vpack.c.bf16 %v286_v23, %v285_v22  ;;  %v288_v26 = vld [vmem:[%s878_s10 + $0x48] sm:$0xff]  ;;  %v289_v28 = vld [vmem:[%s878_s10 + $0x50] sm:$0xff] }
  0x13   :  { %v283_v19 = vld [vmem:[%s878_s10 + $0x20] sm:$0xff]  ;;  %v290_v29 = vld [vmem:[%s878_s10 + $0x58] sm:$0xff]  ;;  %v292_v32 = vld [vmem:[%s878_s10 + $0x68] sm:$0xff] }
  0x14   :  { %554 = vmatpush3.bf16.msra.mxu1 %v553_v61  ;;  %v565_v21 = vpack.c.bf16 %v284_v20, %v283_v19  ;;  %v287_v25 = vld [vmem:[%s878_s10 + $0x40] sm:$0xff]  ;;  %v574_v30 = vpack.c.bf16 %v290_v29, %v289_v28  ;;  %v293_v34 = vld [vmem:[%s878_s10 + $0x70] sm:$0xff]  ;;  %v294_v35 = vld [vmem:[%s878_s10 + $0x78] sm:$0xff] }
  0x15   :  { %533 = vmatpush3.bf16.msra.mxu0 %v532_v39  ;;  %555 = vmatprep.subr.bf16.mxu1 %v589_v3  ;;  %v571_v27 = vpack.c.bf16 %v288_v26, %v287_v25  ;;  %v580_v36 = vpack.c.bf16 %v294_v35, %v293_v34  ;;  %v394_v37 = vld [vmem:[%s880_s7] ss:$0 sm:$0xff] }
  0x16   :  { %535 = vmatprep.subr.bf16.mxu0 %v534_v40  ;;  %v397_v42 = vld [vmem:[%s882_s9] ss:$0 sm:$0xff] }
  0x18   :  { %557 = vmatpush3.bf16.msra.mxu1 %v556_v0 }
  0x19   :  { %537 = vmatpush3.bf16.msra.mxu0 %v536_v45  ;;  %558 = vmatprep.subr.bf16.mxu1 %v589_v3  ;;  %v398_v45 = vld [vmem:[%s883_s11] ss:$0 sm:$0xff] }
  0x1a   :  { %539 = vmatprep.subr.bf16.mxu0 %v538_v46 }
  0x1d   :  { %541 = vmatpush3.bf16.msra.mxu0 %v540_v51 }
  0x1e   :  { %543 = vmatprep.subr.bf16.mxu0 %v542_v52 }
  0x21   :  { %545 = vmatpush3.bf16.msra.mxu0 %v544_v55 }
  0x24   :  { %151 = vmatmul.mubr.f32.vlgmr.msra.gmra.mrb[0].mxu0 %v43_v31  ;;  %v291_v31 = vld [vmem:[%s878_s10 + $0x60] sm:$0xff] }
  0x25   :  { %v577_v33 = vpack.c.bf16 %v292_v32, %v291_v31 }
  0xf7   :  { %v431_v2 = vpop.f32.mrb[0].mxu0 }
  0xf8   :  { %v432_v5 = vpop.f32.mrb[1].mxu0 }
  0xf9   :  { %v433_v6 = vadd.f32 %v432_v5, %v431_v2 }
  0xfb   :  { %v153_v7 = vadd.f32 %v433_v6, %v391_v4 }
  0xfd   :  { %v156_v9 = vmax.f32 %v153_v7, 0.0 }
  0xff   :  { %v164_v13 = vmul.f32 %v392_v8, %v156_v9 }
 0x101   :  { %v172_v15 = vadd.f32 %v393_v12, %v164_v13 }
 0x103   :  { %477 = vmatmul.mubr.msk.f32.vlgmr.msra.gmra.mrb[0].mxu1 %vm188_vm1, %v172_v15 }
 0x104   :  { %560 = vmatpush3.bf16.msra.mxu1 %v559_v14  ;;  %511 = vmatprep.mubr.msk.f32.mxu1 %vm590_vm0, %v591_v1 }
 0x105   :  { %561 = vmatprep.subr.bf16.mxu1 %v589_v3 }
 0x108   :  { %563 = vmatpush3.bf16.msra.mxu1 %v562_v18 }
 0x109   :  { %564 = vmatprep.subr.bf16.mxu1 %v589_v3 }
 0x10c   :  { %566 = vmatpush3.bf16.msra.mxu1 %v565_v21 }
 0x10d   :  { %567 = vmatprep.subr.bf16.mxu1 %v589_v3 }
 0x110   :  { %569 = vmatpush3.bf16.msra.mxu1 %v568_v24 }
 0x111   :  { %570 = vmatprep.subr.bf16.mxu1 %v589_v3 }
 0x114   :  { %572 = vmatpush3.bf16.msra.mxu1 %v571_v27 }
 0x115   :  { %573 = vmatprep.subr.bf16.mxu1 %v589_v3 }
 0x118   :  { %575 = vmatpush3.bf16.msra.mxu1 %v574_v30 }
 0x119   :  { %576 = vmatprep.subr.bf16.mxu1 %v589_v3 }
 0x11c   :  { %578 = vmatpush3.bf16.msra.mxu1 %v577_v33 }
 0x11d   :  { %579 = vmatprep.subr.bf16.mxu1 %v589_v3  ;;  %v396_v3 = vld [vmem:[%s881_s8] ss:$0 sm:$0xff] }
 0x120   :  { %581 = vmatpush3.bf16.msra.mxu1 %v580_v36 }
 0x1d6   :  { %v258_v38 = vpop.f32.mrb[0].mxu1 }
 0x1d7   :  { %v259_v39 = vadd.f32 %v394_v37, %v258_v38  ;;  %v478_v40 = vpop.f32.mrb[1].mxu1 }
 0x1d9   :  { %v262_v41 = vmax.f32 %v259_v39, 0.0 }
 0x1db   :  { %v270_v43 = vmul.f32 %v396_v3, %v262_v41 }
 0x1dd   :  { %v278_v44 = vadd.f32 %v397_v42, %v270_v43 }
 0x1df   :  { %512 = vmatmul.mubr.f32.vlgmr.msra.gmra.mrb[2].mxu1 %v278_v44 }
 0x2b2   :  { %v368_v46 = vpop.f32.mrb[2].mxu1 }
 0x2b3   :  { %v369_v47 = vadd.f32 %v398_v45, %v368_v46  ;;  %v513_v48 = vpop.f32.mrb[3].mxu1 }
 0x2b5   :  { %v373_v49 = vsel %vm372_vm2, %v369_v47, -inf }
 0x2b6   :  { %374 = vmax.xlane.f32.xlu0 %v373_v49 }
 0x343   :  { %v375_v50 = vpop.xlane.xlu0 %374 }
 0x344   :  { %v376_v51 = vsub.f32 %v369_v47, %v375_v50 }
 0x346   :  { %v377_v52 = vmul.f32 1.442695, %v376_v51 }
 0x348   :  { %585 = vpow2.f32 %v377_v52 }
 0x352   :  { %v586_v53 = vpop.eup %585 }
 0x353   :  { %v379_v54 = vsel %vm372_vm2, %v586_v53, 0.0 }
 0x354   :  { %380 = vadd.xlane.f32.xlu0 %v379_v54 }
 0x3e1   :  { %v381_v55 = vpop.xlane.xlu0 %380 }
 0x3e2   :  { %587 = vlog2.f32 %v381_v55 }
 0x3ec   :  { %v588_v56 = vpop.eup %587 }
 0x3ed   :  { %v383_v57 = vmul.f32 0.6931472, %v588_v56 }
 0x3ef   :  { %v384_v58 = vadd.f32 %v383_v57, %v375_v50 }
 0x3f1   :  { %v385_v59 = vsub.f32 %v369_v47, %v384_v58 }
 0x3f3   :  { %386 = vst.msk [vmem:[%s884_s12] sm:$0xf] %vm372_vm2, %v385_v59 }

// kernel: neurosparse_forward.2
= control target key start
LH: loop header
LB: loop body
LE: loop exit
PB: predicated region body
PF: predicated region fallthrough
CT: control target
= control target key end

     0   :  { %s4077_s0 = inlined_call_operand.vmem [shape: f32[64,16], index: 0, kind: input, shape index: {}]   ;;  %s4078_s1 = inlined_call_operand.vmem [shape: f32[4,16,16], index: 1, kind: input, shape index: {}]   ;;  %s4079_s2 = inlined_call_operand.vmem [shape: f32[4,16,16], index: 2, kind: input, shape index: {}]   ;;  %s4080_s3 = inlined_call_operand.vmem [shape: f32[64,16], index: 3, kind: input, shape index: {}]   ;;  %s4081_s4 = inlined_call_operand.vmem [shape: f32[16,16], index: 4, kind: input, shape index: {}]   ;;  %s4082_s5 = inlined_call_operand.vmem [shape: f32[1,16], index: 5, kind: input, shape index: {}]   ;;  %s4083_s6 = inlined_call_operand.vmem [shape: f32[16,16], index: 6, kind: input, shape index: {}]   ;;  %s4084_s7 = inlined_call_operand.vmem [shape: f32[1,16], index: 7, kind: input, shape index: {}]   ;;  %s4085_s8 = inlined_call_operand.vmem [shape: f32[16,16], index: 8, kind: input, shape index: {}]   ;;  %s4086_s9 = inlined_call_operand.vmem [shape: f32[1,16], index: 9, kind: input, shape index: {}]   ;;  %s4087_s10 = inlined_call_operand.hbm [shape: f32[16,16], index: 10, kind: input, shape index: {}]   ;;  %s4088_s11 = inlined_call_operand.vmem [shape: f32[1,16], index: 11, kind: input, shape index: {}]   ;;  %s4089_s12 = inlined_call_operand.hbm [shape: f32[16,16], index: 12, kind: input, shape index: {}]   ;;  %s4090_s13 = inlined_call_operand.hbm [shape: f32[1,16], index: 13, kind: input, shape index: {}]   ;;  %s4091_s14 = inlined_call_operand.hbm [shape: f32[16,16], index: 14, kind: input, shape index: {}]   ;;  %s4092_s15 = inlined_call_operand.vmem [shape: f32[1,16], index: 15, kind: input, shape index: {}]   ;;  %s4093_s16 = inlined_call_operand.vmem [shape: f32[64,16], index: 16, kind: output, shape index: {0}]   ;;  %s4094_s17 = inlined_call_operand.vmem [shape: f32[4,16,16], index: 17, kind: output, shape index: {1}]  }
   0x1   :  { %4097 = sst [smem:[#allocation13_spill]] %s4077_s0 }
   0x2   :  { %4098 = sst [smem:[#allocation14_spill]] %s4078_s1 }
   0x3   :  { %23 = vsyncpa [#allocation4], 0 }
   0x4   :  { %24 = vsyncpa [#allocation6], 0 }
   0x5   :  { %25 = vsyncpa [#allocation9], 0  ;;  %s3521_s24 = smov [#allocation5]   ;;  %s3522_s26 = smov [#allocation3]  }
   0x6   :  { %s65_s25 = sshll.u32 %s3521_s24, 4  ;;  %s51_s27 = sshll.u32 %s3522_s26, 4  ;;  %s66_s25 = int_to_ptr.vmem [resolvable:$true] %s65_s25  ;;  %s3617_s27 = int_to_ptr.vmem [resolvable:$true] %s51_s27 }
   0x7   :  { %s3427_s0 = scalar_lea.hbm %s4089_s12, 256 }
   0x8   :  { %p3428_p0 = scmp.ne.s32.totalorder %s4089_s12, %s3427_s0  ;;  %p3431_p1 = scmp.lt.u32.totalorder %s3427_s0, %s4089_s12 }
   0xa   :  { %p3433_p2 = pnand %p3431_p1, %p3428_p0 }
   0xc   :  { %3436 = shalt.err (!%p3433_p2)
}
   0xd   :  { %s3437_s20 = scalar_lea.vmem %s66_s25, 256  ;;  %p3442_p4 = scmp.lt.s32.totalorder %s66_s25, %s66_s25 }
   0xe   :  { %p3438_p3 = scmp.ne.s32.totalorder %s66_s25, %s3437_s20  ;;  %p3443_p5 = scmp.lt.s32.totalorder %s3437_s20, %s3437_s20 }
  0x10   :  { %p3444_p6 = por %p3443_p5, %p3442_p4 }
  0x12   :  { %p3445_p7 = pnand %p3444_p6, %p3438_p3 }
  0x14   :  { %3448 = shalt.err (!%p3445_p7)
}
  0x15   :  { %s3523_s21 = smov 128   ;;  %s3524_s22 = smov 8  }
  0x16   :  { %71 = dma.hbm_to_vmem [thread:$0]  %s4089_s12, 256, %s66_s25, [#allocation6], %s3523_s21, %s3523_s21, %s3524_s22  }
  0x17   :  { %s3449_s29 = scalar_lea.hbm %s4087_s10, 256 }
  0x18   :  { %p3450_p8 = scmp.ne.s32.totalorder %s4087_s10, %s3449_s29  ;;  %p3453_p9 = scmp.lt.u32.totalorder %s3449_s29, %s4087_s10 }
  0x1a   :  { %p3455_p10 = pnand %p3453_p9, %p3450_p8 }
  0x1c   :  { %3458 = shalt.err (!%p3455_p10)
}
  0x1d   :  { %s3459_s1 = scalar_lea.vmem %s3617_s27, 256  ;;  %p3464_p12 = scmp.lt.s32.totalorder %s3617_s27, %s3617_s27 }
  0x1e   :  { %p3460_p11 = scmp.ne.s32.totalorder %s3617_s27, %s3459_s1  ;;  %p3465_p13 = scmp.lt.s32.totalorder %s3459_s1, %s3459_s1 }
  0x20   :  { %p3466_p0 = por %p3465_p13, %p3464_p12 }
  0x22   :  { %p3467_p1 = pnand %p3466_p0, %p3460_p11 }
  0x24   :  { %3470 = shalt.err (!%p3467_p1)
}
  0x25   :  { %57 = dma.hbm_to_vmem [thread:$0]  %s4087_s10, 256, %s3617_s27, [#allocation4], %s3523_s21, %s3523_s21, %s3524_s22  }
  0x26   :  { %s3525_s20 = smov [#allocation7]   ;;  %s3526_s24 = smov [#allocation8]  }
  0x27   :  { %s78_s23 = sshll.u32 %s3525_s20, 4  ;;  %s87_s26 = sshll.u32 %s3526_s24, 4  ;;  %s79_s23 = int_to_ptr.vmem [resolvable:$true] %s78_s23  ;;  %s3654_s26 = int_to_ptr.vmem [resolvable:$true] %s87_s26 }
  0x28   :  { %s3471_s0 = scalar_lea.hbm %s4090_s13, 16 }
  0x29   :  { %p3472_p2 = scmp.ne.s32.totalorder %s4090_s13, %s3471_s0  ;;  %p3475_p3 = scmp.lt.u32.totalorder %s3471_s0, %s4090_s13 }
  0x2b   :  { %p3477_p4 = pnand %p3475_p3, %p3472_p2 }
  0x2d   :  { %3480 = shalt.err (!%p3477_p4)
}
  0x2e   :  { %s3481_s10 = scalar_lea.vmem %s79_s23, 16  ;;  %s3485_s27 = scalar_lea.vmem %s79_s23, 32 }
  0x2f   :  { %p3482_p5 = scmp.ne.s32.totalorder %s79_s23, %s3481_s10  ;;  %p3486_p6 = scmp.lt.s32.totalorder %s79_s23, %s79_s23 }
  0x30   :  { %p3487_p7 = scmp.lt.s32.totalorder %s3485_s27, %s3481_s10 }
  0x32   :  { %p3488_p8 = por %p3487_p7, %p3486_p6 }
  0x34   :  { %p3489_p9 = pnand %p3488_p8, %p3482_p5 }
  0x36   :  { %3492 = shalt.err (!%p3489_p9)
}
  0x37   :  { %81 = dma.hbm_to_vmem [thread:$0]  %s4090_s13, 16, %s79_s23, [#allocation6]  }
  0x38   :  { %s3493_s28 = scalar_lea.hbm %s4091_s14, 256 }
  0x39   :  { %p3494_p10 = scmp.ne.s32.totalorder %s4091_s14, %s3493_s28  ;;  %p3497_p11 = scmp.lt.u32.totalorder %s3493_s28, %s4091_s14 }
  0x3b   :  { %p3499_p12 = pnand %p3497_p11, %p3494_p10 }
  0x3d   :  { %3502 = shalt.err (!%p3499_p12)
}
  0x3e   :  { %s3503_s19 = scalar_lea.vmem %s3654_s26, 256  ;;  %p3508_p0 = scmp.lt.s32.totalorder %s3654_s26, %s3654_s26 }
  0x3f   :  { %p3504_p13 = scmp.ne.s32.totalorder %s3654_s26, %s3503_s19  ;;  %p3509_p1 = scmp.lt.s32.totalorder %s3503_s19, %s3503_s19 }
  0x41   :  { %p3510_p2 = por %p3509_p1, %p3508_p0 }
  0x43   :  { %p3511_p3 = pnand %p3510_p2, %p3504_p13 }
  0x45   :  { %3514 = shalt.err (!%p3511_p3)
}
  0x46   :  { %93 = dma.hbm_to_vmem [thread:$0]  %s4091_s14, 256, %s3654_s26, [#allocation9], %s3523_s21, %s3523_s21, %s3524_s22  }
  0x47   :  { %3515 = dma.done.wait [#allocation4], 256  }
  0x48   :  { %3516 = vsyncadd [#allocation4], 4294967040 }
  0x49   :  { %3517 = dma.done.wait [#allocation6], 272  }
  0x4a   :  { %3518 = vsyncadd [#allocation6], 4294967024 }
  0x4b   :  { %3519 = dma.done.wait [#allocation9], 256  }
  0x4c   :  { %3520 = vsyncadd [#allocation9], 4294967040  ;;  %vm118_vm0 = vcmask 130048   ;;  %v116_v0 = vld [vmem:[%s4081_s4] sm:$0xff]  ;;  %v117_v1 = vld [vmem:[%s4081_s4 + $0x8] sm:$0xff]  ;;  %s4099_s24 = sld [smem:[#allocation13_spill]] }
  0x4d   :  { %v3293_v3 = vpack.c.bf16 %v117_v1, %v116_v0  ;;  %s4100_s12 = sld [smem:[#allocation14_spill]]  ;;  %v622_v31 = vld [vmem:[%s4083_s6] sm:$0xff]  ;;  %v623_v32 = vld [vmem:[%s4083_s6 + $0x8] sm:$0xff]  ;;  %vm3974_vm1 = vmpackc.low %vm118_vm0, %vm118_vm0 }
  0x4e   :  { %v3313_v33 = vpack.c.bf16 %v623_v32, %v622_v31  ;;  %v2807_v38 = vld [vmem:[%s4082_s5] ss:$0 sm:$0xff] }
  0x4f   :  { %3294 = vmatprep.subr.bf16.mxu0 %v3293_v3 }
  0x50   :  { %3296 = vmatpush3.bf16.msra.mxu0 %v3293_v3  ;;  %v769_v3 = vld [vmem:[%s4085_s8 + $0x8] sm:$0xff] }
  0x51   :  { %3314 = vmatprep.subr.bf16.mxu0 %v3313_v33 }
  0x52   :  { %v108_v2 = vld [vmem:[%s4099_s24] sm:$0xff]  ;;  %v109_v4 = vld [vmem:[%s4099_s24 + $0x8] sm:$0xff]  ;;  %v110_v5 = vld [vmem:[%s4099_s24 + $0x10] sm:$0xff] }
  0x53   :  { %3061 = vmatprep.mubr.msk.f32.mxu0 %vm118_vm0, %v108_v2  ;;  %v111_v6 = vld [vmem:[%s4099_s24 + $0x18] sm:$0xff]  ;;  %v112_v7 = vld [vmem:[%s4099_s24 + $0x20] sm:$0xff]  ;;  %v113_v8 = vld [vmem:[%s4099_s24 + $0x28] sm:$0xff] }
  0x54   :  { %3062 = vmatmul.mubr.msk.f32.vlgmr.msra.gmra.mrb[0].mxu0 %vm118_vm0, %v109_v4  ;;  %v114_v9 = vld [vmem:[%s4099_s24 + $0x30] sm:$0xff]  ;;  %v115_v10 = vld [vmem:[%s4099_s24 + $0x38] sm:$0xff]  ;;  %v3729_v11 = vld [vmem:[%s4100_s12] sm:$0xff] }
  0x55   :  { %3064 = vmatprep.mubr.msk.f32.mxu0 %vm118_vm0, %v110_v5  ;;  %3077 = vmatprep.mubr.msk.f32.mxu1 %vm118_vm0, %v3729_v11  ;;  %v3736_v17 = vld [vmem:[%s4100_s12 + $0x8] sm:$0xff]  ;;  %v3741_v19 = vld [vmem:[%s4100_s12 + $0x10] sm:$0xff]  ;;  %v3750_v22 = vld [vmem:[%s4100_s12 + $0x18] sm:$0xff] }
  0x56   :  { %v3755_v24 = vld [vmem:[%s4100_s12 + $0x20] sm:$0xff]  ;;  %v3764_v25 = vld [vmem:[%s4100_s12 + $0x28] sm:$0xff]  ;;  %v3771_v29 = vld [vmem:[%s4100_s12 + $0x30] sm:$0xff]  ;;  %3316 = vmatpush3.bf16.msra.mxu0 %v3313_v33 }
  0x57   :  { %v3778_v30 = vld [vmem:[%s4100_s12 + $0x38] sm:$0xff]  ;;  %v768_v2 = vld [vmem:[%s4085_s8] sm:$0xff] }
  0x58   :  { %3065 = vmatmul.mubr.msk.f32.gmra.mrb[2].mxu0 %vm118_vm0, %v111_v6  ;;  %v3317_v5 = vpack.c.bf16 %v769_v3, %v768_v2  ;;  %v2808_v6 = vld [vmem:[%s4084_s7] ss:$0 sm:$0xff] }
  0x59   :  { %3067 = vmatprep.mubr.msk.f32.mxu0 %vm118_vm0, %v112_v7 }
  0x5c   :  { %3068 = vmatmul.mubr.msk.f32.gmra.mrb[4].mxu0 %vm118_vm0, %v113_v8 }
  0x5d   :  { %3070 = vmatprep.mubr.msk.f32.mxu0 %vm118_vm0, %v114_v9 }
  0x60   :  { %3071 = vmatmul.mubr.msk.f32.gmra.mrb[6].mxu0 %vm118_vm0, %v115_v10 }
 0x127   :  { %v3063_v12 = vpop.f32.mrb[0].mxu0 }
 0x128   :  { %v209_v13 = vpop.f32.mrb[1].mxu0 }
 0x129   :  { %v3297_v14 = vpack.c.bf16 %v3063_v12, %v209_v13 }
 0x12b   :  { %v3066_v15 = vpop.f32.mrb[2].mxu0  ;;  %3298 = vmatprep.subr.bf16.mxu1 %v3297_v14 }
 0x12c   :  { %v219_v16 = vpop.f32.mrb[3].mxu0  ;;  %3300 = vmatpush3.bf16.msra.mxu1 %v3297_v14 }
 0x12d   :  { %v3301_v18 = vpack.c.bf16 %v3066_v15, %v219_v16 }
 0x12f   :  { %v3069_v20 = vpop.f32.mrb[4].mxu0  ;;  %3078 = vmatmul.mubr.msk.f32.vlgmr.msra.gmra.mrb[0].mxu1 %vm118_vm0, %v3736_v17  ;;  %3302 = vmatprep.subr.bf16.mxu1 %v3301_v18 }
 0x130   :  { %v229_v21 = vpop.f32.mrb[5].mxu0  ;;  %3304 = vmatpush3.bf16.msra.mxu1 %v3301_v18  ;;  %3084 = vmatprep.mubr.msk.f32.mxu1 %vm118_vm0, %v3741_v19 }
 0x131   :  { %v3305_v23 = vpack.c.bf16 %v3069_v20, %v229_v21 }
 0x133   :  { %3085 = vmatmul.mubr.msk.f32.vlgmr.msra.gmra.mrb[2].mxu1 %vm118_vm0, %v3750_v22  ;;  %3306 = vmatprep.subr.bf16.mxu1 %v3305_v23  ;;  %v3072_v26 = vpop.f32.mrb[6].mxu0 }
 0x134   :  { %3308 = vmatpush3.bf16.msra.mxu1 %v3305_v23  ;;  %3091 = vmatprep.mubr.msk.f32.mxu1 %vm118_vm0, %v3755_v24  ;;  %v239_v27 = vpop.f32.mrb[7].mxu0 }
 0x135   :  { %v3309_v28 = vpack.c.bf16 %v3072_v26, %v239_v27 }
 0x137   :  { %3092 = vmatmul.mubr.msk.f32.vlgmr.msra.gmra.mrb[4].mxu1 %vm118_vm0, %v3764_v25  ;;  %3310 = vmatprep.subr.bf16.mxu1 %v3309_v28 }
 0x138   :  { %3312 = vmatpush3.bf16.msra.mxu1 %v3309_v28  ;;  %3098 = vmatprep.mubr.msk.f32.mxu1 %vm118_vm0, %v3771_v29 }
 0x139   :  { %3318 = vmatprep.subr.bf16.mxu1 %v3317_v5 }
 0x13b   :  { %3099 = vmatmul.mubr.msk.f32.vlgmr.msra.gmra.mrb[6].mxu1 %vm118_vm0, %v3778_v30 }
 0x13c   :  { %3320 = vmatpush3.bf16.msra.mxu1 %v3317_v5 }
 0x202   :  { %v3079_v34 = vpop.f32.mrb[0].mxu1 }
 0x203   :  { %332 = vst.msk [vmem:[#allocation2 + $0x8] sm:$0xff] %vm118_vm0, %v3079_v34  ;;  %v322_v35 = vpop.f32.mrb[1].mxu1 }
 0x204   :  { %331 = vst.msk [vmem:[#allocation2] sm:$0xff] %vm118_vm0, %v322_v35 }
 0x206   :  { %v3086_v36 = vpop.f32.mrb[2].mxu1 }
 0x207   :  { %418 = vst.msk [vmem:[#allocation2 + $0x18] sm:$0xff] %vm118_vm0, %v3086_v36  ;;  %v408_v37 = vpop.f32.mrb[3].mxu1 }
 0x208   :  { %417 = vst.msk [vmem:[#allocation2 + $0x10] sm:$0xff] %vm118_vm0, %v408_v37 }
 0x20a   :  { %v3093_v39 = vpop.f32.mrb[4].mxu1  ;;  %v592_v40 = vld [vmem:[#allocation2 + $0x8] sm:$0xff] }
 0x20b   :  { %504 = vst.msk [vmem:[#allocation2 + $0x28] sm:$0xff] %vm118_vm0, %v3093_v39  ;;  %v494_v41 = vpop.f32.mrb[5].mxu1  ;;  %v591_v42 = vld [vmem:[#allocation2] sm:$0xff]  ;;  %v607_v43 = vadd.f32 %v2807_v38, %v592_v40 }
 0x20c   :  { %503 = vst.msk [vmem:[#allocation2 + $0x20] sm:$0xff] %vm118_vm0, %v494_v41  ;;  %v606_v44 = vadd.f32 %v2807_v38, %v591_v42 }
 0x20d   :  { %v615_v47 = vmax.f32 %v607_v43, 0.0 }
 0x20e   :  { %v614_v45 = vmax.f32 %v606_v44, 0.0  ;;  %v594_v46 = vld [vmem:[#allocation2 + $0x18] sm:$0xff]  ;;  %v3100_v59 = vpop.f32.mrb[6].mxu1 }
 0x20f   :  { %v593_v48 = vld [vmem:[#allocation2 + $0x10] sm:$0xff]  ;;  %v609_v49 = vadd.f32 %v2807_v38, %v594_v46  ;;  %590 = vst.msk [vmem:[#allocation2 + $0x38] sm:$0xff] %vm118_vm0, %v3100_v59  ;;  %v580_v60 = vpop.f32.mrb[7].mxu1 }
 0x210   :  { %3105 = vmatprep.mubr.msk.f32.mxu0 %vm118_vm0, %v614_v45  ;;  %v608_v50 = vadd.f32 %v2807_v38, %v593_v48  ;;  %589 = vst.msk [vmem:[#allocation2 + $0x30] sm:$0xff] %vm118_vm0, %v580_v60  ;;  %v1271_v48 = vld [vmem:[#allocation3 + $0x8] sm:$0xff] }
 0x211   :  { %3106 = vmatmul.mubr.msk.f32.vlgmr.msra.gmra.mrb[8].mxu0 %vm118_vm0, %v615_v47  ;;  %v617_v53 = vmax.f32 %v609_v49, 0.0 }
 0x212   :  { %v616_v51 = vmax.f32 %v608_v50, 0.0  ;;  %v596_v52 = vld [vmem:[#allocation2 + $0x28] sm:$0xff] }
 0x213   :  { %v595_v54 = vld [vmem:[#allocation2 + $0x20] sm:$0xff]  ;;  %v611_v55 = vadd.f32 %v2807_v38, %v596_v52 }
 0x214   :  { %3108 = vmatprep.mubr.msk.f32.mxu0 %vm118_vm0, %v616_v51  ;;  %v610_v56 = vadd.f32 %v2807_v38, %v595_v54 }
 0x215   :  { %3109 = vmatmul.mubr.msk.f32.gmra.mrb[10].mxu0 %vm118_vm0, %v617_v53  ;;  %v619_v58 = vmax.f32 %v611_v55, 0.0 }
 0x216   :  { %v618_v57 = vmax.f32 %v610_v56, 0.0  ;;  %v598_v63 = vld [vmem:[#allocation2 + $0x38] sm:$0xff] }
 0x217   :  { %v597_v61 = vld [vmem:[#allocation2 + $0x30] sm:$0xff]  ;;  %v613_v0 = vadd.f32 %v2807_v38, %v598_v63 }
 0x218   :  { %3111 = vmatprep.mubr.msk.f32.mxu0 %vm118_vm0, %v618_v57  ;;  %v612_v62 = vadd.f32 %v2807_v38, %v597_v61 }
 0x219   :  { %3112 = vmatmul.mubr.msk.f32.gmra.mrb[12].mxu0 %vm118_vm0, %v619_v58  ;;  %v621_v4 = vmax.f32 %v613_v0, 0.0 }
 0x21a   :  { %v620_v1 = vmax.f32 %v612_v62, 0.0 }
 0x21c   :  { %3114 = vmatprep.mubr.msk.f32.mxu0 %vm118_vm0, %v620_v1 }
 0x21d   :  { %3115 = vmatmul.mubr.msk.f32.gmra.mrb[14].mxu0 %vm118_vm0, %v621_v4 }
 0x21e   :  { %3137 = vmatprep.mubr.msk.f32.mxu0 %vm118_vm0, %v3729_v11 }
 0x2e4   :  { %v3107_v7 = vpop.f32.mrb[8].mxu0 }
 0x2e5   :  { %v727_v8 = vadd.f32 %v3107_v7, %v2808_v6  ;;  %v721_v9 = vpop.f32.mrb[9].mxu0 }
 0x2e6   :  { %v722_v10 = vadd.f32 %v2808_v6, %v721_v9  ;;  %v1408_v9 = vld [vmem:[#allocation5] sm:$0xff] }
 0x2e7   :  { %v761_v14 = vmax.f32 %v727_v8, 0.0 }
 0x2e8   :  { %v760_v12 = vmax.f32 %v722_v10, 0.0  ;;  %v3110_v13 = vpop.f32.mrb[10].mxu0  ;;  %v1409_v10 = vld [vmem:[#allocation5 + $0x8] sm:$0xff] }
 0x2e9   :  { %v737_v15 = vadd.f32 %v3110_v13, %v2808_v6  ;;  %v731_v16 = vpop.f32.mrb[11].mxu0 }
 0x2ea   :  { %v732_v18 = vadd.f32 %v2808_v6, %v731_v16  ;;  %3121 = vmatprep.mubr.msk.f32.mxu1 %vm118_vm0, %v760_v12  ;;  %v3341_v12 = vpack.c.bf16 %v1409_v10, %v1408_v9 }
 0x2eb   :  { %3122 = vmatmul.mubr.msk.f32.vlgmr.msra.gmra.mrb[8].mxu1 %vm118_vm0, %v761_v14  ;;  %v763_v21 = vmax.f32 %v737_v15, 0.0 }
 0x2ec   :  { %v762_v11 = vmax.f32 %v732_v18, 0.0  ;;  %v3113_v20 = vpop.f32.mrb[12].mxu0 }
 0x2ed   :  { %v747_v23 = vadd.f32 %v3113_v20, %v2808_v6  ;;  %v741_v26 = vpop.f32.mrb[13].mxu0  ;;  %v2840_v20 = vld [vmem:[%s4088_s11] ss:$0 sm:$0xff] }
 0x2ee   :  { %v742_v27 = vadd.f32 %v2808_v6, %v741_v26  ;;  %3124 = vmatprep.mubr.msk.f32.mxu1 %vm118_vm0, %v762_v11 }
 0x2ef   :  { %3125 = vmatmul.mubr.msk.f32.gmra.mrb[10].mxu1 %vm118_vm0, %v763_v21  ;;  %v765_v31 = vmax.f32 %v747_v23, 0.0 }
 0x2f0   :  { %v764_v28 = vmax.f32 %v742_v27, 0.0  ;;  %v3116_v32 = vpop.f32.mrb[14].mxu0 }
 0x2f1   :  { %v751_v33 = vpop.f32.mrb[15].mxu0  ;;  %v757_v35 = vadd.f32 %v3116_v32, %v2808_v6 }
 0x2f2   :  { %3127 = vmatprep.mubr.msk.f32.mxu1 %vm118_vm0, %v764_v28  ;;  %v752_v34 = vadd.f32 %v2808_v6, %v751_v33 }
 0x2f3   :  { %3128 = vmatmul.mubr.msk.f32.gmra.mrb[12].mxu1 %vm118_vm0, %v765_v31  ;;  %v767_v37 = vmax.f32 %v757_v35, 0.0 }
 0x2f4   :  { %v766_v36 = vmax.f32 %v752_v34, 0.0 }
 0x2f6   :  { %3130 = vmatprep.mubr.msk.f32.mxu1 %vm118_vm0, %v766_v36 }
 0x2f7   :  { %3131 = vmatmul.mubr.msk.f32.gmra.mrb[14].mxu1 %vm118_vm0, %v767_v37 }
 0x2f8   :  { %3144 = vmatprep.mubr.msk.f32.mxu1 %vm118_vm0, %v3741_v19 }
 0x3be   :  { %v3123_v38 = vpop.f32.mrb[8].mxu1 }
 0x3bf   :  { %v860_v39 = vpop.f32.mrb[9].mxu1 }
 0x3c0   :  { %v3321_v40 = vpack.c.bf16 %v3123_v38, %v860_v39 }
 0x3c2   :  { %v3126_v41 = vpop.f32.mrb[10].mxu1  ;;  %3322 = vmatprep.subr.bf16.mxu0 %v3321_v40 }
 0x3c3   :  { %v870_v42 = vpop.f32.mrb[11].mxu1  ;;  %3324 = vmatpush3.bf16.msra.mxu0 %v3321_v40 }
 0x3c4   :  { %v3325_v43 = vpack.c.bf16 %v3126_v41, %v870_v42  ;;  %v1539_v42 = vld [vmem:[%s4079_s2] sm:$0xff] }
 0x3c6   :  { %v3129_v44 = vpop.f32.mrb[12].mxu1  ;;  %3138 = vmatmul.mubr.msk.f32.vlgmr.msra.gmra.mrb[16].mxu0 %vm118_vm0, %v3736_v17  ;;  %3326 = vmatprep.subr.bf16.mxu1 %v3325_v43 }
 0x3c7   :  { %v880_v45 = vpop.f32.mrb[13].mxu1  ;;  %3328 = vmatpush3.bf16.msra.mxu1 %v3325_v43  ;;  %3151 = vmatprep.mubr.msk.f32.mxu0 %vm118_vm0, %v3755_v24  ;;  %v1270_v24 = vld [vmem:[#allocation3] sm:$0xff] }
 0x3c8   :  { %v3329_v46 = vpack.c.bf16 %v3129_v44, %v880_v45  ;;  %v3337_v49 = vpack.c.bf16 %v1271_v48, %v1270_v24  ;;  %v3880_v24 = vld [vmem:[%s4079_s2 + $0x20] sm:$0xff] }
 0x3c9   :  { %v1913_v48 = vld [vmem:[#allocation8] sm:$0xff] }
 0x3ca   :  { %3145 = vmatmul.mubr.msk.f32.vlgmr.msra.gmra.mrb[16].mxu1 %vm118_vm0, %v3750_v22  ;;  %3330 = vmatprep.subr.bf16.mxu0 %v3329_v46  ;;  %v3132_v19 = vpop.f32.mrb[14].mxu1 }
 0x3cb   :  { %3332 = vmatpush3.bf16.msra.mxu0 %v3329_v46  ;;  %3158 = vmatprep.mubr.msk.f32.mxu1 %vm118_vm0, %v3771_v29  ;;  %v890_v17 = vpop.f32.mrb[15].mxu1 }
 0x3cc   :  { %v3333_v47 = vpack.c.bf16 %v3132_v19, %v890_v17  ;;  %3338 = vmatprep.subr.bf16.mxu0 %v3337_v49  ;;  %v1540_v17 = vld [vmem:[%s4079_s2 + $0x8] sm:$0xff] }
 0x3ce   :  { %3152 = vmatmul.mubr.msk.f32.vlgmr.msra.gmra.mrb[18].mxu0 %vm118_vm0, %v3764_v25  ;;  %3334 = vmatprep.subr.bf16.mxu1 %v3333_v47 }
 0x3cf   :  { %3336 = vmatpush3.bf16.msra.mxu1 %v3333_v47  ;;  %3340 = vmatpush3.bf16.msra.mxu0 %v3337_v49  ;;  %v1914_v49 = vld [vmem:[#allocation8 + $0x8] sm:$0xff] }
 0x3d0   :  { %3342 = vmatprep.subr.bf16.mxu1 %v3341_v12 }
 0x3d2   :  { %3159 = vmatmul.mubr.msk.f32.vlgmr.msra.gmra.mrb[18].mxu1 %vm118_vm0, %v3778_v30  ;;  %v2839_v30 = vld [vmem:[%s4086_s9] ss:$0 sm:$0xff] }
 0x3d3   :  { %3344 = vmatpush3.bf16.msra.mxu1 %v3341_v12 }
 0x499   :  { %v3139_v22 = vpop.f32.mrb[16].mxu0 }
 0x49a   :  { %983 = vst.msk [vmem:[#allocation2 + $0x8] sm:$0xff] %vm118_vm0, %v3139_v22  ;;  %v973_v29 = vpop.f32.mrb[17].mxu0 }
 0x49b   :  { %982 = vst.msk [vmem:[#allocation2] sm:$0xff] %vm118_vm0, %v973_v29 }
 0x49d   :  { %v3146_v25 = vpop.f32.mrb[16].mxu1 }
 0x49e   :  { %1068 = vst.msk [vmem:[#allocation2 + $0x18] sm:$0xff] %vm118_vm0, %v3146_v25  ;;  %v1058_v50 = vpop.f32.mrb[17].mxu1 }
 0x49f   :  { %1067 = vst.msk [vmem:[#allocation2 + $0x10] sm:$0xff] %vm118_vm0, %v1058_v50  ;;  %v3361_v50 = vpack.c.bf16 %v1914_v49, %v1913_v48 }
 0x4a1   :  { %v3153_v51 = vpop.f32.mrb[18].mxu0  ;;  %v1240_v52 = vld [vmem:[#allocation2 + $0x8] sm:$0xff] }
 0x4a2   :  { %1153 = vst.msk [vmem:[#allocation2 + $0x28] sm:$0xff] %vm118_vm0, %v3153_v51  ;;  %v1143_v53 = vpop.f32.mrb[19].mxu0  ;;  %v1239_v54 = vld [vmem:[#allocation2] sm:$0xff]  ;;  %v1255_v55 = vadd.f32 %v2839_v30, %v1240_v52 }
 0x4a3   :  { %1152 = vst.msk [vmem:[#allocation2 + $0x20] sm:$0xff] %vm118_vm0, %v1143_v53  ;;  %v1254_v56 = vadd.f32 %v2839_v30, %v1239_v54  ;;  %v2859_v54 = vld [vmem:[%s4079_s2 + $0x10] sm:$0xff] }
 0x4a4   :  { %v1263_v59 = vmax.f32 %v1255_v55, 0.0  ;;  %v2860_v55 = vld [vmem:[%s4079_s2 + $0x18] sm:$0xff] }
 0x4a5   :  { %v1262_v57 = vmax.f32 %v1254_v56, 0.0  ;;  %v1242_v58 = vld [vmem:[#allocation2 + $0x18] sm:$0xff]  ;;  %v3160_v7 = vpop.f32.mrb[18].mxu1  ;;  %v2867_v56 = vld [vmem:[%s4079_s2 + $0x30] sm:$0xff] }
 0x4a6   :  { %v1241_v60 = vld [vmem:[#allocation2 + $0x10] sm:$0xff]  ;;  %v1257_v61 = vadd.f32 %v2839_v30, %v1242_v58  ;;  %1238 = vst.msk [vmem:[#allocation2 + $0x38] sm:$0xff] %vm118_vm0, %v3160_v7  ;;  %v1228_v8 = vpop.f32.mrb[19].mxu1 }
 0x4a7   :  { %3165 = vmatprep.mubr.msk.f32.mxu0 %vm118_vm0, %v1262_v57  ;;  %v1256_v62 = vadd.f32 %v2839_v30, %v1241_v60  ;;  %1237 = vst.msk [vmem:[#allocation2 + $0x30] sm:$0xff] %vm118_vm0, %v1228_v8  ;;  %v2868_v57 = vld [vmem:[%s4079_s2 + $0x38] sm:$0xff] }
 0x4a8   :  { %3166 = vmatmul.mubr.msk.f32.vlgmr.msra.gmra.mrb[20].mxu0 %vm118_vm0, %v1263_v59  ;;  %v1265_v1 = vmax.f32 %v1257_v61, 0.0 }
 0x4a9   :  { %v1264_v63 = vmax.f32 %v1256_v62, 0.0  ;;  %v1244_v0 = vld [vmem:[#allocation2 + $0x28] sm:$0xff] }
 0x4aa   :  { %v1243_v2 = vld [vmem:[#allocation2 + $0x20] sm:$0xff]  ;;  %v1259_v3 = vadd.f32 %v2839_v30, %v1244_v0 }
 0x4ab   :  { %3168 = vmatprep.mubr.msk.f32.mxu0 %vm118_vm0, %v1264_v63  ;;  %v1258_v4 = vadd.f32 %v2839_v30, %v1243_v2 }
 0x4ac   :  { %3169 = vmatmul.mubr.msk.f32.gmra.mrb[22].mxu0 %vm118_vm0, %v1265_v1  ;;  %v1267_v6 = vmax.f32 %v1259_v3, 0.0 }
 0x4ad   :  { %v1266_v5 = vmax.f32 %v1258_v4, 0.0  ;;  %v1246_v15 = vld [vmem:[#allocation2 + $0x38] sm:$0xff] }
 0x4ae   :  { %v1245_v13 = vld [vmem:[#allocation2 + $0x30] sm:$0xff]  ;;  %v1261_v16 = vadd.f32 %v2839_v30, %v1246_v15 }
 0x4af   :  { %3171 = vmatprep.mubr.msk.f32.mxu0 %vm118_vm0, %v1266_v5  ;;  %v1260_v14 = vadd.f32 %v2839_v30, %v1245_v13  ;;  %v2864_v30 = vld [vmem:[%s4079_s2 + $0x28] sm:$0xff] }
 0x4b0   :  { %3172 = vmatmul.mubr.msk.f32.gmra.mrb[24].mxu0 %vm118_vm0, %v1267_v6  ;;  %v1269_v11 = vmax.f32 %v1261_v16, 0.0 }
 0x4b1   :  { %v1268_v18 = vmax.f32 %v1260_v14, 0.0 }
 0x4b3   :  { %3174 = vmatprep.mubr.msk.f32.mxu0 %vm118_vm0, %v1268_v18 }
 0x4b4   :  { %3175 = vmatmul.mubr.msk.f32.gmra.mrb[26].mxu0 %vm118_vm0, %v1269_v11 }
 0x4b5   :  { %3197 = vmatprep.mubr.msk.f32.mxu0 %vm118_vm0, %v1539_v42 }
 0x57b   :  { %v3167_v21 = vpop.f32.mrb[20].mxu0 }
 0x57c   :  { %v1369_v23 = vpop.f32.mrb[21].mxu0  ;;  %v1375_v27 = vadd.f32 %v3167_v21, %v2840_v20 }
 0x57d   :  { %v1370_v26 = vadd.f32 %v2840_v20, %v1369_v23 }
 0x57f   :  { %v3170_v28 = vpop.f32.mrb[22].mxu0  ;;  %3181 = vmatprep.mubr.msk.f32.mxu1 %vm118_vm0, %v1370_v26 }
 0x580   :  { %v1379_v31 = vpop.f32.mrb[23].mxu0  ;;  %3182 = vmatmul.mubr.msk.f32.vlgmr.msra.gmra.mrb[20].mxu1 %vm118_vm0, %v1375_v27  ;;  %v1385_v33 = vadd.f32 %v3170_v28, %v2840_v20 }
 0x581   :  { %v1380_v32 = vadd.f32 %v2840_v20, %v1379_v31 }
 0x583   :  { %v3173_v34 = vpop.f32.mrb[24].mxu0  ;;  %3184 = vmatprep.mubr.msk.f32.mxu1 %vm118_vm0, %v1380_v32 }
 0x584   :  { %v1389_v35 = vpop.f32.mrb[25].mxu0  ;;  %3185 = vmatmul.mubr.msk.f32.gmra.mrb[22].mxu1 %vm118_vm0, %v1385_v33  ;;  %v1395_v37 = vadd.f32 %v3173_v34, %v2840_v20 }
 0x585   :  { %v1390_v36 = vadd.f32 %v2840_v20, %v1389_v35 }
 0x587   :  { %3187 = vmatprep.mubr.msk.f32.mxu1 %vm118_vm0, %v1390_v36  ;;  %v3176_v38 = vpop.f32.mrb[26].mxu0 }
 0x588   :  { %3188 = vmatmul.mubr.msk.f32.gmra.mrb[24].mxu1 %vm118_vm0, %v1395_v37  ;;  %v1399_v39 = vpop.f32.mrb[27].mxu0  ;;  %v1405_v41 = vadd.f32 %v3176_v38, %v2840_v20 }
 0x589   :  { %v1400_v40 = vadd.f32 %v2840_v20, %v1399_v39 }
 0x58b   :  { %3190 = vmatprep.mubr.msk.f32.mxu1 %vm118_vm0, %v1400_v40 }
 0x58c   :  { %3191 = vmatmul.mubr.msk.f32.gmra.mrb[26].mxu1 %vm118_vm0, %v1405_v41 }
 0x58d   :  { %3204 = vmatprep.mubr.msk.f32.mxu1 %vm118_vm0, %v2859_v54 }
 0x653   :  { %v3183_v43 = vpop.f32.mrb[20].mxu1 }
 0x654   :  { %v1500_v44 = vpop.f32.mrb[21].mxu1 }
 0x655   :  { %v3345_v45 = vpack.c.bf16 %v3183_v43, %v1500_v44 }
 0x657   :  { %3346 = vmatprep.subr.bf16.mxu0 %v3345_v45  ;;  %v3186_v46 = vpop.f32.mrb[22].mxu1 }
 0x658   :  { %3348 = vmatpush3.bf16.msra.mxu0 %v3345_v45  ;;  %v1510_v19 = vpop.f32.mrb[23].mxu1 }
 0x659   :  { %v3349_v47 = vpack.c.bf16 %v3186_v46, %v1510_v19 }
 0x65b   :  { %v3189_v22 = vpop.f32.mrb[24].mxu1  ;;  %3350 = vmatprep.subr.bf16.mxu1 %v3349_v47  ;;  %3198 = vmatmul.mubr.msk.f32.vlgmr.msra.gmra.mrb[28].mxu0 %vm118_vm0, %v1540_v17 }
 0x65c   :  { %v1520_v29 = vpop.f32.mrb[25].mxu1  ;;  %3352 = vmatpush3.bf16.msra.mxu1 %v3349_v47  ;;  %3211 = vmatprep.mubr.msk.f32.mxu0 %vm118_vm0, %v3880_v24 }
 0x65d   :  { %v3353_v25 = vpack.c.bf16 %v3189_v22, %v1520_v29 }
 0x65f   :  { %3354 = vmatprep.subr.bf16.mxu0 %v3353_v25  ;;  %v3192_v51 = vpop.f32.mrb[26].mxu1  ;;  %3205 = vmatmul.mubr.msk.f32.vlgmr.msra.gmra.mrb[28].mxu1 %vm118_vm0, %v2860_v55 }
 0x660   :  { %3356 = vmatpush3.bf16.msra.mxu0 %v3353_v25  ;;  %v1530_v52 = vpop.f32.mrb[27].mxu1  ;;  %3218 = vmatprep.mubr.msk.f32.mxu1 %vm118_vm0, %v2867_v56 }
 0x661   :  { %3362 = vmatprep.subr.bf16.mxu0 %v3361_v50  ;;  %v3357_v53 = vpack.c.bf16 %v3192_v51, %v1530_v52  ;;  %v2871_v51 = vld [vmem:[#allocation7] ss:$0 sm:$0xff] }
 0x663   :  { %3212 = vmatmul.mubr.msk.f32.vlgmr.msra.gmra.mrb[30].mxu0 %vm118_vm0, %v2864_v30  ;;  %3358 = vmatprep.subr.bf16.mxu1 %v3357_v53 }
 0x664   :  { %3364 = vmatpush3.bf16.msra.mxu0 %v3361_v50  ;;  %3225 = vmatprep.mubr.msk.f32.mxu0 %vm118_vm0, %v1370_v26 }
 0x665   :  { %3360 = vmatpush3.bf16.msra.mxu1 %v3357_v53 }
 0x667   :  { %3226 = vmatmul.mubr.msk.f32.vlgmr.msra.gmra.mrb[32].mxu0 %vm118_vm0, %v1375_v27  ;;  %v2894_v27 = vld [vmem:[%s4092_s15] ss:$0 sm:$0xff] }
 0x668   :  { %3228 = vmatprep.mubr.msk.f32.mxu0 %vm118_vm0, %v1380_v32  ;;  %3219 = vmatmul.mubr.msk.f32.vlgmr.msra.gmra.mrb[30].mxu1 %vm118_vm0, %v2868_v57 }
 0x669   :  { %3241 = vmatprep.mubr.msk.f32.mxu1 %vm118_vm0, %v1539_v42 }
 0x66b   :  { %3229 = vmatmul.mubr.msk.f32.gmra.mrb[34].mxu0 %vm118_vm0, %v1385_v33 }
 0x66c   :  { %3231 = vmatprep.mubr.msk.f32.mxu0 %vm118_vm0, %v1390_v36 }
 0x66f   :  { %3232 = vmatmul.mubr.msk.f32.gmra.mrb[36].mxu0 %vm118_vm0, %v1395_v37 }
 0x670   :  { %3234 = vmatprep.mubr.msk.f32.mxu0 %vm118_vm0, %v1400_v40 }
 0x673   :  { %3235 = vmatmul.mubr.msk.f32.gmra.mrb[38].mxu0 %vm118_vm0, %v1405_v41 }
 0x72e   :  { %v3199_v58 = vpop.f32.mrb[28].mxu0 }
 0x72f   :  { %1623 = vst.msk [vmem:[#allocation2 + $0x8] sm:$0xff] %vm118_vm0, %v3199_v58  ;;  %v1613_v59 = vpop.f32.mrb[29].mxu0 }
 0x730   :  { %1622 = vst.msk [vmem:[#allocation2] sm:$0xff] %vm118_vm0, %v1613_v59 }
 0x732   :  { %v3206_v10 = vpop.f32.mrb[28].mxu1 }
 0x733   :  { %1709 = vst.msk [vmem:[#allocation2 + $0x18] sm:$0xff] %vm118_vm0, %v3206_v10  ;;  %v1699_v12 = vpop.f32.mrb[29].mxu1 }
 0x734   :  { %1708 = vst.msk [vmem:[#allocation2 + $0x10] sm:$0xff] %vm118_vm0, %v1699_v12 }
 0x736   :  { %v3213_v60 = vpop.f32.mrb[30].mxu0  ;;  %v1883_v15 = vld [vmem:[#allocation2 + $0x8] sm:$0xff] }
 0x737   :  { %1795 = vst.msk [vmem:[#allocation2 + $0x28] sm:$0xff] %vm118_vm0, %v3213_v60  ;;  %v1785_v61 = vpop.f32.mrb[31].mxu0  ;;  %v1882_v18 = vld [vmem:[#allocation2] sm:$0xff]  ;;  %v1898_v58 = vadd.f32 %v2871_v51, %v1883_v15  ;;  %v2393_v15 = vld [vmem:[%s4080_s3 + $0x10] sm:$0xff] }
 0x738   :  { %1794 = vst.msk [vmem:[#allocation2 + $0x20] sm:$0xff] %vm118_vm0, %v1785_v61  ;;  %v1897_v61 = vadd.f32 %v2871_v51, %v1882_v18 }
 0x73a   :  { %v3227_v62 = vpop.f32.mrb[32].mxu0  ;;  %v3932_v20 = vld [vmem:[#allocation2 + $0x18] sm:$0xff] }
 0x73b   :  { %v1981_v63 = vpop.f32.mrb[33].mxu0  ;;  %v3220_v13 = vpop.f32.mrb[30].mxu1  ;;  %v3935_v23 = vld [vmem:[#allocation2 + $0x10] sm:$0xff] }
 0x73c   :  { %v3365_v0 = vpack.c.bf16 %v3227_v62, %v1981_v63  ;;  %1881 = vst.msk [vmem:[#allocation2 + $0x38] sm:$0xff] %vm118_vm0, %v3220_v13  ;;  %v1871_v14 = vpop.f32.mrb[31].mxu1  ;;  %v2392_v62 = vld [vmem:[%s4080_s3 + $0x8] sm:$0xff]  ;;  %v1899_v12 = vadd.f32 %v2871_v51, %v3935_v23  ;;  %v2394_v13 = vld [vmem:[%s4080_s3 + $0x18] sm:$0xff] }
 0x73d   :  { %1880 = vst.msk [vmem:[#allocation2 + $0x30] sm:$0xff] %vm118_vm0, %v1871_v14 }
 0x73e   :  { %v3230_v1 = vpop.f32.mrb[34].mxu0  ;;  %3366 = vmatprep.subr.bf16.mxu1 %v3365_v0  ;;  %v3941_v28 = vld [vmem:[#allocation2 + $0x28] sm:$0xff] }
 0x73f   :  { %v1991_v2 = vpop.f32.mrb[35].mxu0  ;;  %3368 = vmatpush3.bf16.msra.mxu1 %v3365_v0  ;;  %v3944_v33 = vld [vmem:[#allocation2 + $0x20] sm:$0xff] }
 0x740   :  { %v3369_v3 = vpack.c.bf16 %v3230_v1, %v1991_v2  ;;  %v2391_v0 = vld [vmem:[%s4080_s3] sm:$0xff] }
 0x742   :  { %v3233_v4 = vpop.f32.mrb[36].mxu0  ;;  %3242 = vmatmul.mubr.msk.f32.vlgmr.msra.gmra.mrb[32].mxu1 %vm118_vm0, %v1540_v17  ;;  %3370 = vmatprep.subr.bf16.mxu1 %v3369_v3 }
 0x743   :  { %v2001_v5 = vpop.f32.mrb[37].mxu0  ;;  %3372 = vmatpush3.bf16.msra.mxu1 %v3369_v3  ;;  %3248 = vmatprep.mubr.msk.f32.mxu1 %vm118_vm0, %v2859_v54  ;;  %v3947_v39 = vld [vmem:[#allocation2 + $0x38] sm:$0xff] }
 0x744   :  { %v3373_v6 = vpack.c.bf16 %v3233_v4, %v2001_v5  ;;  %v3950_v43 = vld [vmem:[#allocation2 + $0x30] sm:$0xff]  ;;  %v1906_v5 = vmax.f32 %v1898_v58, 0.0 }
 0x746   :  { %v3236_v7 = vpop.f32.mrb[38].mxu0  ;;  %3249 = vmatmul.mubr.msk.f32.vlgmr.msra.gmra.mrb[34].mxu1 %vm118_vm0, %v2860_v55  ;;  %3374 = vmatprep.subr.bf16.mxu1 %v3373_v6 }
 0x747   :  { %v2011_v8 = vpop.f32.mrb[39].mxu0  ;;  %3376 = vmatpush3.bf16.msra.mxu1 %v3373_v6  ;;  %3255 = vmatprep.mubr.msk.f32.mxu1 %vm118_vm0, %v3880_v24  ;;  %v1900_v6 = vadd.f32 %v2871_v51, %v3932_v20 }
 0x748   :  { %v3377_v9 = vpack.c.bf16 %v3236_v7, %v2011_v8 }
 0x749   :  { %v1908_v20 = vmax.f32 %v1900_v6, 0.0 }
 0x74a   :  { %3256 = vmatmul.mubr.msk.f32.vlgmr.msra.gmra.mrb[36].mxu1 %vm118_vm0, %v2864_v30  ;;  %3378 = vmatprep.subr.bf16.mxu1 %v3377_v9 }
 0x74b   :  { %3380 = vmatpush3.bf16.msra.mxu1 %v3377_v9  ;;  %3262 = vmatprep.mubr.msk.f32.mxu1 %vm118_vm0, %v2867_v56  ;;  %v1905_v9 = vmax.f32 %v1897_v61, 0.0 }
 0x74e   :  { %3263 = vmatmul.mubr.msk.f32.vlgmr.msra.gmra.mrb[38].mxu1 %vm118_vm0, %v2868_v57 }
 0x815   :  { %v3243_v16 = vpop.f32.mrb[32].mxu1 }
 0x816   :  { %2104 = vst.msk [vmem:[#allocation2 + $0x8] sm:$0xff] %vm118_vm0, %v3243_v16  ;;  %v2094_v11 = vpop.f32.mrb[33].mxu1 }
 0x817   :  { %2103 = vst.msk [vmem:[#allocation2] sm:$0xff] %vm118_vm0, %v2094_v11 }
 0x819   :  { %v3250_v21 = vpop.f32.mrb[34].mxu1 }
 0x81a   :  { %2189 = vst.msk [vmem:[#allocation2 + $0x18] sm:$0xff] %vm118_vm0, %v3250_v21  ;;  %v2179_v26 = vpop.f32.mrb[35].mxu1  ;;  %v1902_v21 = vadd.f32 %v2871_v51, %v3941_v28 }
 0x81b   :  { %2188 = vst.msk [vmem:[#allocation2 + $0x10] sm:$0xff] %vm118_vm0, %v2179_v26 }
 0x81d   :  { %v3257_v31 = vpop.f32.mrb[36].mxu1  ;;  %v2361_v32 = vld [vmem:[#allocation2 + $0x8] sm:$0xff] }
 0x81e   :  { %2274 = vst.msk [vmem:[#allocation2 + $0x28] sm:$0xff] %vm118_vm0, %v3257_v31  ;;  %v2264_v34 = vpop.f32.mrb[37].mxu1  ;;  %v2360_v35 = vld [vmem:[#allocation2] sm:$0xff]  ;;  %v2376_v36 = vadd.f32 %v2894_v27, %v2361_v32  ;;  %v1907_v31 = vmax.f32 %v1899_v12, 0.0 }
 0x81f   :  { %2273 = vst.msk [vmem:[#allocation2 + $0x20] sm:$0xff] %vm118_vm0, %v2264_v34  ;;  %v2375_v37 = vadd.f32 %v2894_v27, %v2360_v35  ;;  %v2396_v34 = vld [vmem:[%s4080_s3 + $0x28] sm:$0xff] }
 0x820   :  { %v2384_v38 = vmax.f32 %v2376_v36, 0.0  ;;  %v2395_v36 = vld [vmem:[%s4080_s3 + $0x20] sm:$0xff] }
 0x821   :  { %v3264_v40 = vpop.f32.mrb[38].mxu1  ;;  %v2383_v41 = vmax.f32 %v2375_v37, 0.0  ;;  %v2363_v42 = vld [vmem:[#allocation2 + $0x18] sm:$0xff] }
 0x822   :  { %2359 = vst.msk [vmem:[#allocation2 + $0x38] sm:$0xff] %vm118_vm0, %v3264_v40  ;;  %v2349_v44 = vpop.f32.mrb[39].mxu1  ;;  %v2401_v45 = vmul.f32 1.442695, %v2384_v38  ;;  %v2362_v46 = vld [vmem:[#allocation2 + $0x10] sm:$0xff]  ;;  %v2378_v19 = vadd.f32 %v2894_v27, %v2363_v42  ;;  %v1910_v40 = vmax.f32 %v1902_v21, 0.0 }
 0x823   :  { %2358 = vst.msk [vmem:[#allocation2 + $0x30] sm:$0xff] %vm118_vm0, %v2349_v44  ;;  %v2399_v17 = vmul.f32 1.442695, %v2383_v41  ;;  %v2377_v47 = vadd.f32 %v2894_v27, %v2362_v46  ;;  %v1904_v41 = vadd.f32 %v2871_v51, %v3947_v39 }
 0x824   :  { %3411 = vpow2.f32 %v2401_v45  ;;  %v2386_v24 = vmax.f32 %v2378_v19, 0.0  ;;  %v1903_v45 = vadd.f32 %v2871_v51, %v3950_v43  ;;  %v2398_v19 = vld [vmem:[%s4080_s3 + $0x38] sm:$0xff] }
 0x825   :  { %3413 = vpow2.f32 %v2399_v17  ;;  %v2385_v48 = vmax.f32 %v2377_v47, 0.0  ;;  %v2365_v49 = vld [vmem:[#allocation2 + $0x28] sm:$0xff]  ;;  %v2397_v47 = vld [vmem:[%s4080_s3 + $0x30] sm:$0xff] }
 0x826   :  { %v2405_v22 = vmul.f32 1.442695, %v2386_v24  ;;  %v2364_v29 = vld [vmem:[#allocation2 + $0x20] sm:$0xff]  ;;  %v2380_v25 = vadd.f32 %v2894_v27, %v2365_v49  ;;  %v1912_v49 = vmax.f32 %v1904_v41, 0.0 }
 0x827   :  { %v2403_v50 = vmul.f32 1.442695, %v2385_v48  ;;  %v2379_v30 = vadd.f32 %v2894_v27, %v2364_v29  ;;  %v1911_v29 = vmax.f32 %v1903_v45, 0.0 }
 0x828   :  { %3415 = vpow2.f32 %v2405_v22  ;;  %v2388_v52 = vmax.f32 %v2380_v25, 0.0 }
 0x829   :  { %3417 = vpow2.f32 %v2403_v50  ;;  %v2387_v53 = vmax.f32 %v2379_v30, 0.0  ;;  %v2367_v54 = vld [vmem:[#allocation2 + $0x38] sm:$0xff] }
 0x82a   :  { %v2409_v55 = vmul.f32 1.442695, %v2388_v52  ;;  %v2366_v56 = vld [vmem:[#allocation2 + $0x30] sm:$0xff]  ;;  %v2382_v57 = vadd.f32 %v2894_v27, %v2367_v54 }
 0x82b   :  { %v2407_v59 = vmul.f32 1.442695, %v2387_v53  ;;  %v2381_v60 = vadd.f32 %v2894_v27, %v2366_v56  ;;  %v1901_v27 = vadd.f32 %v2871_v51, %v3944_v33 }
 0x82c   :  { %3419 = vpow2.f32 %v2409_v55  ;;  %v2390_v63 = vmax.f32 %v2382_v57, 0.0 }
 0x82d   :  { %3421 = vpow2.f32 %v2407_v59  ;;  %v2389_v1 = vmax.f32 %v2381_v60, 0.0  ;;  %v1909_v44 = vmax.f32 %v1901_v27, 0.0 }
 0x82e   :  { %v3412_v2 = vpop.eup %3411  ;;  %v2413_v3 = vmul.f32 1.442695, %v2390_v63 }
 0x82f   :  { %v3414_v4 = vpop.eup %3413  ;;  %v2416_v7 = vmul.f32 %v3412_v2, %v2392_v62  ;;  %v2411_v8 = vmul.f32 1.442695, %v2389_v1 }
 0x830   :  { %v2415_v10 = vmul.f32 %v3414_v4, %v2391_v0  ;;  %3423 = vpow2.f32 %v2413_v3 }
 0x831   :  { %v2424_v14 = vadd.f32 %v2416_v7, %v1906_v5  ;;  %3425 = vpow2.f32 %v2411_v8 }
 0x832   :  { %v3416_v16 = vpop.eup %3415  ;;  %v2423_v18 = vadd.f32 %v2415_v10, %v1905_v9 }
 0x833   :  { %v3418_v11 = vpop.eup %3417  ;;  %2432 = vst.msk [vmem:[%s4093_s16 + $0x8] sm:$0xff] %vm118_vm0, %v2424_v14  ;;  %v2418_v26 = vmul.f32 %v3416_v16, %v2394_v13 }
 0x834   :  { %2431 = vst.msk [vmem:[%s4093_s16] sm:$0xff] %vm118_vm0, %v2423_v18  ;;  %3269 = vmatprep.mubr.msk.f32.mxu0 %vm118_vm0, %v2423_v18  ;;  %v3381_v28 = vpack.c.bf16 %v2424_v14, %v2423_v18  ;;  %v2417_v32 = vmul.f32 %v3418_v11, %v2393_v15 }
 0x835   :  { %v2426_v35 = vadd.f32 %v2418_v26, %v1908_v20 }
 0x836   :  { %v3420_v33 = vpop.eup %3419  ;;  %3383 = vmatprep.subr.msk.bf16.mxu0 %vm3974_vm1, %v3381_v28  ;;  %v2425_v37 = vadd.f32 %v2417_v32, %v1907_v31 }
 0x837   :  { %v3422_v38 = vpop.eup %3421  ;;  %3386 = vmatpush3.bf16.xpose.msk.msra.mxu0 %vm3974_vm1, %v3381_v28  ;;  %2434 = vst.msk [vmem:[%s4093_s16 + $0x18] sm:$0xff] %vm118_vm0, %v2426_v35  ;;  %v2420_v42 = vmul.f32 %v3420_v33, %v2396_v34 }
 0x838   :  { %2433 = vst.msk [vmem:[%s4093_s16 + $0x10] sm:$0xff] %vm118_vm0, %v2425_v37  ;;  %3276 = vmatprep.mubr.msk.f32.mxu1 %vm118_vm0, %v2425_v37  ;;  %v3387_v39 = vpack.c.bf16 %v2426_v35, %v2425_v37  ;;  %v2419_v46 = vmul.f32 %v3422_v38, %v2395_v36 }
 0x839   :  { %v2428_v17 = vadd.f32 %v2420_v42, %v1910_v40 }
 0x83a   :  { %v3424_v24 = vpop.eup %3423  ;;  %3389 = vmatprep.subr.msk.bf16.mxu1 %vm3974_vm1, %v3387_v39  ;;  %v2427_v43 = vadd.f32 %v2419_v46, %v1909_v44 }
 0x83b   :  { %v3426_v48 = vpop.eup %3425  ;;  %3392 = vmatpush3.bf16.xpose.msk.msra.mxu1 %vm3974_vm1, %v3387_v39  ;;  %2436 = vst.msk [vmem:[%s4093_s16 + $0x28] sm:$0xff] %vm118_vm0, %v2428_v17  ;;  %v2422_v22 = vmul.f32 %v3424_v24, %v2398_v19 }
 0x83c   :  { %2435 = vst.msk [vmem:[%s4093_s16 + $0x20] sm:$0xff] %vm118_vm0, %v2427_v43  ;;  %v3393_v25 = vpack.c.bf16 %v2428_v17, %v2427_v43  ;;  %v2421_v50 = vmul.f32 %v3426_v48, %v2397_v47 }
 0x83d   :  { %v2430_v30 = vadd.f32 %v2422_v22, %v1912_v49 }
 0x83e   :  { %3270 = vmatmul.mubr.msk.f32.vlgmr.msra.gmra.mrb[40].mxu0 %vm118_vm0, %v2424_v14  ;;  %3395 = vmatprep.subr.msk.bf16.mxu0 %vm3974_vm1, %v3393_v25  ;;  %v2429_v51 = vadd.f32 %v2421_v50, %v1911_v29 }
 0x83f   :  { %3398 = vmatpush3.bf16.xpose.msk.msra.mxu0 %vm3974_vm1, %v3393_v25  ;;  %3283 = vmatprep.mubr.msk.f32.mxu0 %vm118_vm0, %v2427_v43  ;;  %2438 = vst.msk [vmem:[%s4093_s16 + $0x38] sm:$0xff] %vm118_vm0, %v2430_v30 }
 0x840   :  { %2437 = vst.msk [vmem:[%s4093_s16 + $0x30] sm:$0xff] %vm118_vm0, %v2429_v51  ;;  %v3399_v52 = vpack.c.bf16 %v2430_v30, %v2429_v51 }
 0x842   :  { %3277 = vmatmul.mubr.msk.f32.vlgmr.msra.gmra.mrb[40].mxu1 %vm118_vm0, %v2426_v35  ;;  %3401 = vmatprep.subr.msk.bf16.mxu1 %vm3974_vm1, %v3399_v52 }
 0x843   :  { %3404 = vmatpush3.bf16.xpose.msk.msra.mxu1 %vm3974_vm1, %v3399_v52  ;;  %3290 = vmatprep.mubr.msk.f32.mxu1 %vm118_vm0, %v2429_v51 }
 0x846   :  { %3284 = vmatmul.mubr.msk.f32.vlgmr.msra.gmra.mrb[42].mxu0 %vm118_vm0, %v2428_v17 }
 0x84a   :  { %3291 = vmatmul.mubr.msk.f32.vlgmr.msra.gmra.mrb[42].mxu1 %vm118_vm0, %v2430_v30 }
 0x911   :  { %v3271_v53 = vpop.f32.mrb[40].mxu0 }
 0x912   :  { %2521 = vst.msk [vmem:[%s4094_s17 + $0x8] sm:$0xff] %vm118_vm0, %v3271_v53  ;;  %v2511_v54 = vpop.f32.mrb[41].mxu0 }
 0x913   :  { %2520 = vst.msk [vmem:[%s4094_s17] sm:$0xff] %vm118_vm0, %v2511_v54 }
 0x915   :  { %v3278_v55 = vpop.f32.mrb[40].mxu1 }
 0x916   :  { %2904 = vst.msk [vmem:[%s4094_s17 + $0x18] sm:$0xff] %vm118_vm0, %v3278_v55  ;;  %v2594_v56 = vpop.f32.mrb[41].mxu1 }
 0x917   :  { %2903 = vst.msk [vmem:[%s4094_s17 + $0x10] sm:$0xff] %vm118_vm0, %v2594_v56 }
 0x919   :  { %v3285_v57 = vpop.f32.mrb[42].mxu0 }
 0x91a   :  { %2910 = vst.msk [vmem:[%s4094_s17 + $0x28] sm:$0xff] %vm118_vm0, %v3285_v57  ;;  %v2678_v58 = vpop.f32.mrb[43].mxu0 }
 0x91b   :  { %2909 = vst.msk [vmem:[%s4094_s17 + $0x20] sm:$0xff] %vm118_vm0, %v2678_v58 }
 0x91d   :  { %v3292_v59 = vpop.f32.mrb[42].mxu1 }
 0x91e   :  { %2916 = vst.msk [vmem:[%s4094_s17 + $0x38] sm:$0xff] %vm118_vm0, %v3292_v59  ;;  %v2762_v60 = vpop.f32.mrb[43].mxu1 }
 0x91f   :  { %2915 = vst.msk [vmem:[%s4094_s17 + $0x30] sm:$0xff] %vm118_vm0, %v2762_v60 }
 0x920   :  { %2782 = vsyncpa [#allocation4], 1 }
 0x921   :  { %2783 = vsyncpa [#allocation6], 1 }
 0x922   :  { %2784 = vsyncpa [#allocation9], 1 }

</bundles_post_ra>
